<compile_context>
chip_gen: v7x
topology: tpu7x:2x2x1
jax: 0.10.0
libtpu: 0.0.40
codegen_flags: <defaults>
</compile_context>

<pallas_src>
import functools
import math

import jax
import jax.numpy as jnp
from jax.experimental import pallas as pl
from jax.experimental.pallas import tpu as pltpu


def _round_up(x, m):
    return ((x + m - 1) // m) * m


def _vmem_budget_bytes():
    """~3/4 of the chip's VMEM capacity (<= 48 MiB on v7x, ~96 MiB on v5e/v6e)."""
    try:
        cap = int(pltpu.get_tpu_info().vmem_capacity_bytes)
    except Exception:
        cap = 64 * 1024 * 1024
    return max(16 * 1024 * 1024, min((3 * cap) // 4, 100 * 1024 * 1024))


def _choose_group_size(BK, M, D, vmem_budget):
    """Chunks (of M tokens) processed per grid step.

    Maximize rows (G*M) per step -- amortizes the ~0.35us/step pipeline
    overhead and keeps loads/stores dense -- subject to a rough VMEM estimate.
    G is kept a multiple of 8 (sublane-dense f32 output stores); BK is padded
    by the caller so divisibility never forces a degenerate G.
    """
    # Rough per-token-row VMEM bytes: f32 X (double-buffered) + f32 fused-qkv
    # scratch + bf16 matmul copies + f32 score/exp rows + slack.
    per_row = 2 * 4 * D + 4 * 3 * D + 2 * 3 * D + 2 * 4 * M + 4 * D
    rows = max(M, min(2048, (vmem_budget // 3) // max(per_row, 1)))
    G = max(1, min(rows // M, BK))
    if G >= 8:
        G -= G % 8
    return max(G, 1)


def _chunked_attention_kernel(x_ref, wqkv_ref, wr_ref, o_ref, qkv_ref, *,
                              G, M, num_heads, head_size):
    """One grid step = G chunks of M tokens.

    x_ref    : (1, G*M, D)          f32   input tokens (G chunks, flattened)
    wqkv_ref : (D, 3*D)             bf16  fused [Wq*scale | Wk | Wv]
    wr_ref   : (M, 1)               f32   sequence-reduction weights Linear(M,1)
    o_ref    : (1, H, G, hs)        f32   per-head reduced chunk vectors
    qkv_ref  : (G*M, 3*D)           f32   VMEM scratch for the fused projection
    """
    D = num_heads * head_size

    # Fused QKV projection: one (G*M, D) x (D, 3D) MXU matmul (bf16 in, f32 acc).
    x = x_ref[0].astype(jnp.bfloat16)                       # cast on-chip
    qkv_ref[...] = jnp.dot(x, wqkv_ref[...],
                           preferred_element_type=jnp.float32)

    # Causal mask: built once per grid step, shared by all chunks and heads.
    row = jax.lax.broadcasted_iota(jnp.int32, (M, M), 0)
    col = jax.lax.broadcasted_iota(jnp.int32, (M, M), 1)
    causal = (row >= col)[None, :, :]                        # (1, M, M)

    wr_q = wr_ref[...].reshape(1, M, 1)                      # (1, M, 1) f32

    # Static head loop; every iteration is batched over all G chunks.
    for h in range(num_heads):
        lo = h * head_size
        # Per-head views: static lane-slice loads from the VMEM scratch,
        # reshaped in f32, cast to bf16 only for the MXU operands.
        q3 = qkv_ref[:, lo:lo + head_size].reshape(
            G, M, head_size).astype(jnp.bfloat16)
        k3 = qkv_ref[:, D + lo:D + lo + head_size].reshape(
            G, M, head_size).astype(jnp.bfloat16)
        v3 = qkv_ref[:, 2 * D + lo:2 * D + lo + head_size].reshape(
            G, M, head_size).astype(jnp.bfloat16)

        # Scores for all G chunks of this head in one batched matmul; the
        # 1/sqrt(hs) scale is already folded into the Wq columns.
        s = jnp.einsum('gqe,gke->gqk', q3, k3,
                       preferred_element_type=jnp.float32)   # (G, M, M)
        # Finite large-negative mask (never produces inf-inf -> NaN, even for
        # the zero-padded chunks).
        s = jnp.where(causal, s, jnp.float32(-1e30))

        # Softmax numerator in f32; 1/denominator is folded together with the
        # sequence-reduction weights so normalized probs are never built.
        m_ = jnp.max(s, axis=-1, keepdims=True)
        e = jnp.exp(s - m_)                                   # (G, M, M)
        denom = jnp.sum(e, axis=-1, keepdims=True)            # (G, M, 1)
        w_d = wr_q * pl.reciprocal(denom, approx=True)        # (G, M, 1)

        # Unnormalized attention output: o_e[g, q, :] = e[g, q, :] @ v[g].
        o_e = jnp.einsum('gqk,gke->gqe', e.astype(jnp.bfloat16), v3,
                         preferred_element_type=jnp.float32)  # (G, M, hs)

        # Sequence reduction (Linear(M, 1)) folded BEFORE the (hoisted)
        # output projection: r_h[g, :] = sum_q wr[q]/denom[g, q] * o_e[g, q, :].
        o_ref[0, h] = jnp.sum(o_e * w_d, axis=1)              # (G, hs)


def chunked_attention_forward(X, params, *, C, M, num_heads, group_size=None):
    """ChunkedAttention.forward: (B, C_in, D) -> (B, k, D) with k = C // M."""
    B, C_in, D = X.shape
    assert C % M == 0 and D % num_heads == 0
    # Match F.pad(X, (0, 0, C - C_in, 0)): pad at the FRONT, or truncate.
    if C_in < C:
        X = jnp.pad(X, ((0, 0), (C - C_in, 0), (0, 0)))
    elif C_in > C:
        X = X[:, :C, :]
    kblocks = C // M
    BK = B * kblocks
    hs = D // num_heads

    vmem_budget = _vmem_budget_bytes()
    G = group_size if group_size is not None else _choose_group_size(
        BK, M, D, vmem_budget)
    BK_pad = _round_up(BK, G)            # pad with zero chunks, sliced off below
    num_groups = BK_pad // G
    # Note: on v7x (2 TensorCores) an even num_groups keeps both cores busy;
    # on v5e/v6e (single core) maximizing G per step is the right default.

    Xr = X.reshape(BK, M, D)
    if BK_pad != BK:
        Xr = jnp.pad(Xr, ((0, BK_pad - BK), (0, 0), (0, 0)))
    Xg = Xr.reshape(num_groups, G * M, D)        # native f32; bf16 cast on-chip

    scale = 1.0 / math.sqrt(hs)
    # Fused (D, 3D) projection weight, score scale folded into the Wq columns.
    wqkv = jnp.concatenate(
        [params["wq"] * scale, params["wk"], params["wv"]],
        axis=1).astype(jnp.bfloat16)
    wr_col = params["wr"].reshape(M, 1).astype(jnp.float32)

    kernel = functools.partial(_chunked_attention_kernel, G=G, M=M,
                               num_heads=num_heads, head_size=hs)

    r = pl.pallas_call(
        kernel,
        out_shape=jax.ShapeDtypeStruct((num_groups, num_heads, G, hs),
                                       jnp.float32),
        grid_spec=pltpu.PrefetchScalarGridSpec(
            num_scalar_prefetch=0,
            grid=(num_groups,),
            in_specs=[
                pl.BlockSpec((1, G * M, D), lambda i: (i, 0, 0)),   # X (G chunks/step)
                pl.BlockSpec((D, 3 * D), lambda i: (0, 0)),         # fused Wqkv (resident)
                pl.BlockSpec((M, 1), lambda i: (0, 0)),             # wr column
            ],
            out_specs=pl.BlockSpec((1, num_heads, G, hs),
                                   lambda i: (i, 0, 0, 0)),
            scratch_shapes=[pltpu.VMEM((G * M, 3 * D), jnp.float32)],
        ),
        compiler_params=pltpu.CompilerParams(
            dimension_semantics=("parallel",),
            vmem_limit_bytes=int(vmem_budget)),
    )(Xg, wqkv, wr_col)

    # Per-head reduced chunk vectors -> head-concatenated rows (B*k, D).
    r = r.transpose(0, 2, 1, 3).reshape(BK_pad, D)[:BK]

    # Output projection + bias, hoisted out of the kernel (per perf review):
    # one well-shaped f32 matmul over all B*k rows; since the reduction is
    # linear, reduce(cat @ Wo + bo) == reduce(cat) @ Wo + sum(wr) * bo.
    out = r @ params["wo"] + params["bo"] * jnp.sum(params["wr"])

    # Dropout(p=0.0) == identity (eval semantics).
    return out.reshape(B, kblocks, D)


def reference_forward(X, params, *, C, M, num_heads):
    """Pure-JAX f32 reference mirroring the PyTorch module (for validation)."""
    B, C_in, D = X.shape
    if C_in < C:
        X = jnp.pad(X, ((0, 0), (C - C_in, 0), (0, 0)))
    elif C_in > C:
        X = X[:, :C, :]
    kblocks = C // M
    hs = D // num_heads
    Xr = X.reshape(B * kblocks, M, D)
    q = Xr @ params["wq"]
    k = Xr @ params["wk"]
    v = Xr @ params["wv"]

    def split(t):
        return t.reshape(B * kblocks, M, num_heads, hs).transpose(0, 2, 1, 3)

    q, k, v = split(q), split(k), split(v)
    s = jnp.einsum('bhqe,bhke->bhqk', q, k) / math.sqrt(hs)
    mask = jnp.tril(jnp.ones((M, M), dtype=bool))
    s = jnp.where(mask, s, -jnp.inf)
    p = jax.nn.softmax(s, axis=-1)
    o = jnp.einsum('bhqk,bhke->bhqe', p, v)
    cat = o.transpose(0, 2, 1, 3).reshape(B * kblocks, M, D)
    y = cat @ params["wo"] + params["bo"]
    red = jnp.einsum('m,bmd->bd', params["wr"][0], y)
    return red.reshape(B, kblocks, D)


def init_params(key, D, M):
    """Deterministic synthetic parameter init (PyTorch-Linear-style uniform)."""
    ks = jax.random.split(key, 7)
    bd = 1.0 / math.sqrt(D)
    bm = 1.0 / math.sqrt(M)
    return {
        # Per-head q/k/v Linear(D, head_size, bias=False) packed column-wise
        # into (D, D): columns [h*hs:(h+1)*hs] belong to head h.
        "wq": jax.random.uniform(ks[0], (D, D), jnp.float32, -bd, bd),
        "wk": jax.random.uniform(ks[1], (D, D), jnp.float32, -bd, bd),
        "wv": jax.random.uniform(ks[2], (D, D), jnp.float32, -bd, bd),
        # MHA output projection Linear(D, D) with bias.
        "wo": jax.random.uniform(ks[3], (D, D), jnp.float32, -bd, bd),
        "bo": jax.random.uniform(ks[4], (1, D), jnp.float32, -bd, bd),
        # Sequence reducer Linear(M, 1, bias=False).
        "wr": jax.random.uniform(ks[5], (1, M), jnp.float32, -bm, bm),
    }


if __name__ == "__main__":
    # Small shapes consistent with the module: C % M == 0, D % num_heads == 0.
    B, C, M, D, NUM_HEADS = 2, 32, 8, 32, 4

    key = jax.random.PRNGKey(0)
    kx, kp = jax.random.split(key)
    X = jax.random.normal(kx, (B, C, D), jnp.float32)
    params = init_params(kp, D, M)

    out = chunked_attention_forward(X, params, C=C, M=M, num_heads=NUM_HEADS)
    out = jax.block_until_ready(out)

    assert out.shape == (B, C // M, D), out.shape
    assert bool(jnp.all(jnp.isfinite(out)))

    # Validate against the pure-JAX f32 reference (bf16 MXU operands + approx
    # reciprocal -> loose tolerance).
    ref = reference_forward(X, params, C=C, M=M, num_heads=NUM_HEADS)
    max_err = float(jnp.max(jnp.abs(out - ref)))
    assert max_err < 5e-2, f"kernel/reference mismatch: max abs err = {max_err}"

    print("KERNEL_OK")
</pallas_src>

<mosaic_0001>
module attributes {stable_mosaic.version = 11 : i64} {
  func.func @_chunked_attention_kernel(%arg0: i32, %arg1: memref<1x64x32xf32, #tpu.memory_space<vmem>>, %arg2: memref<32x96xbf16, #tpu.memory_space<vmem>>, %arg3: memref<8x1xf32, #tpu.memory_space<vmem>>, %arg4: memref<1x4x8x8xf32, #tpu.memory_space<vmem>>, %arg5: memref<64x96xf32, #tpu.memory_space<vmem>>) attributes {dimension_semantics = [#tpu.dimension_semantics<parallel>], iteration_bounds = array<i64: 1>, scalar_prefetch = 0 : i64, scratch_operands = 1 : i64, tpu.core_type = #tpu.core_type<tc>, window_params = [{transform_indices = @transform_0, window_bounds = array<i64: 1, 64, 32>}, {pipeline_mode = #tpu.pipeline_mode<synchronous>, transform_indices = @transform_1, window_bounds = array<i64: 32, 96>}, {pipeline_mode = #tpu.pipeline_mode<synchronous>, transform_indices = @transform_2, window_bounds = array<i64: 8, 1>}, {transform_indices = @transform_3, window_bounds = array<i64: 1, 4, 8, 8>}]} {
    %c0 = arith.constant 0 : index
    %c0_0 = arith.constant 0 : index
    %c0_1 = arith.constant 0 : index
    %0 = vector.load %arg1[%c0, %c0_0, %c0_1] : memref<1x64x32xf32, #tpu.memory_space<vmem>>, vector<1x64x32xf32>
    %1 = vector.shape_cast %0 : vector<1x64x32xf32> to vector<64x32xf32>
    %2 = arith.truncf %1 : vector<64x32xf32> to vector<64x32xbf16>
    %c0_2 = arith.constant 0 : index
    %c0_3 = arith.constant 0 : index
    %3 = vector.load %arg2[%c0_2, %c0_3] : memref<32x96xbf16, #tpu.memory_space<vmem>>, vector<32x96xbf16>
    %cst = arith.constant dense<0.000000e+00> : vector<64x96xf32>
    %4 = tpu.matmul %2, %3, %cst {dimension_numbers = #tpu.dot_dimension_numbers<[1], [0], [0], [1], [0, 0, 1, 1], [], []>} : vector<64x32xbf16>, vector<32x96xbf16>, vector<64x96xf32> -> vector<64x96xf32>
    %c0_4 = arith.constant 0 : index
    %c0_5 = arith.constant 0 : index
    %5 = vector.load %arg5[%c0_4, %c0_5] : memref<64x96xf32, #tpu.memory_space<vmem>>, vector<64x96xf32>
    tpu.vector_store %arg5[%c0_4, %c0_5], %4 {strides = array<i32>} : memref<64x96xf32, #tpu.memory_space<vmem>>, vector<64x96xf32>,
    %6 = tpu.iota {dimensions = array<i32: 0>} : vector<8x8xi32>
    %7 = tpu.iota {dimensions = array<i32: 1>} : vector<8x8xi32>
    %8 = arith.cmpi sge, %6, %7 : vector<8x8xi32>
    %9 = vector.shape_cast %8 : vector<8x8xi1> to vector<1x8x8xi1>
    %c0_6 = arith.constant 0 : index
    %c0_7 = arith.constant 0 : index
    %10 = vector.load %arg3[%c0_6, %c0_7] : memref<8x1xf32, #tpu.memory_space<vmem>>, vector<8x1xf32>
    %11 = vector.shape_cast %10 : vector<8x1xf32> to vector<1x8x1xf32>
    %c0_8 = arith.constant 0 : index
    %c0_9 = arith.constant 0 : index
    %12 = vector.load %arg5[%c0_8, %c0_9] : memref<64x96xf32, #tpu.memory_space<vmem>>, vector<64x8xf32>
    %13 = vector.shape_cast %12 : vector<64x8xf32> to vector<8x8x8xf32>
    %14 = arith.truncf %13 : vector<8x8x8xf32> to vector<8x8x8xbf16>
    %c0_10 = arith.constant 0 : index
    %c32 = arith.constant 32 : index
    %15 = vector.load %arg5[%c0_10, %c32] : memref<64x96xf32, #tpu.memory_space<vmem>>, vector<64x8xf32>
    %16 = vector.shape_cast %15 : vector<64x8xf32> to vector<8x8x8xf32>
    %17 = arith.truncf %16 : vector<8x8x8xf32> to vector<8x8x8xbf16>
    %c0_11 = arith.constant 0 : index
    %c64 = arith.constant 64 : index
    %18 = vector.load %arg5[%c0_11, %c64] : memref<64x96xf32, #tpu.memory_space<vmem>>, vector<64x8xf32>
    %19 = vector.shape_cast %18 : vector<64x8xf32> to vector<8x8x8xf32>
    %20 = arith.truncf %19 : vector<8x8x8xf32> to vector<8x8x8xbf16>
    "tpu.trace_start"() <{level = 10 : i32, message = "gqe,gke->gqk"}> : () -> ()
    %cst_12 = arith.constant dense<0.000000e+00> : vector<8x8x8xf32>
    %21 = tpu.matmul %14, %17, %cst_12 {dimension_numbers = #tpu.dot_dimension_numbers<[2], [2], [1], [1], [0, 0, 0, 1, 1, 1], [0], [0]>} : vector<8x8x8xbf16>, vector<8x8x8xbf16>, vector<8x8x8xf32> -> vector<8x8x8xf32>
    %cst_13 = arith.constant -1.000000e+30 : f32
    "tpu.trace_stop"() : () -> ()
    %22 = vector.shape_cast %9 : vector<1x8x8xi1> to vector<1x8x8xi1>
    %23 = vector.broadcast %22 : vector<1x8x8xi1> to vector<8x8x8xi1>
    %24 = vector.broadcast %cst_13 : f32 to vector<8x8x8xf32>
    %25 = arith.select %23, %21, %24 : vector<8x8x8xi1>, vector<8x8x8xf32>
    %cst_14 = arith.constant dense<0xFF800000> : vector<8x8xf32>
    %26 = vector.multi_reduction <maximumf>, %25, %cst_14 [2] : vector<8x8x8xf32> to vector<8x8xf32>
    %27 = vector.shape_cast %26 : vector<8x8xf32> to vector<8x8x1xf32>
    %28 = vector.broadcast %27 : vector<8x8x1xf32> to vector<8x8x8xf32>
    %29 = arith.subf %25, %28 : vector<8x8x8xf32>
    %30 = math.exp %29 : vector<8x8x8xf32>
    %cst_15 = arith.constant dense<0.000000e+00> : vector<8x8xf32>
    %31 = vector.multi_reduction <add>, %30, %cst_15 [2] : vector<8x8x8xf32> to vector<8x8xf32>
    %32 = vector.shape_cast %31 : vector<8x8xf32> to vector<8x8x1xf32>
    %33 = tpu.reciprocal %32 {approx = true} : vector<8x8x1xf32> -> vector<8x8x1xf32>
    %34 = vector.broadcast %11 : vector<1x8x1xf32> to vector<8x8x1xf32>
    %35 = arith.mulf %34, %33 : vector<8x8x1xf32>
    %36 = arith.truncf %30 : vector<8x8x8xf32> to vector<8x8x8xbf16>
    "tpu.trace_start"() <{level = 10 : i32, message = "gqk,gke->gqe"}> : () -> ()
    %cst_16 = arith.constant dense<0.000000e+00> : vector<8x8x8xf32>
    %37 = tpu.matmul %36, %20, %cst_16 {dimension_numbers = #tpu.dot_dimension_numbers<[2], [1], [1], [2], [0, 0, 0, 1, 1, 2], [0], [0]>} : vector<8x8x8xbf16>, vector<8x8x8xbf16>, vector<8x8x8xf32> -> vector<8x8x8xf32>
    "tpu.trace_stop"() : () -> ()
    %38 = vector.broadcast %35 : vector<8x8x1xf32> to vector<8x8x8xf32>
    %39 = arith.mulf %37, %38 : vector<8x8x8xf32>
    %cst_17 = arith.constant dense<0.000000e+00> : vector<8x8xf32>
    %40 = vector.multi_reduction <add>, %39, %cst_17 [1] : vector<8x8x8xf32> to vector<8x8xf32>
    %c0_18 = arith.constant 0 : index
    %c0_19 = arith.constant 0 : index
    %c0_20 = arith.constant 0 : index
    %c0_21 = arith.constant 0 : index
    %41 = vector.load %arg4[%c0_18, %c0_19, %c0_20, %c0_21] : memref<1x4x8x8xf32, #tpu.memory_space<vmem>>, vector<1x1x8x8xf32>
    %42 = vector.shape_cast %41 : vector<1x1x8x8xf32> to vector<8x8xf32>
    %43 = vector.shape_cast %40 : vector<8x8xf32> to vector<1x1x8x8xf32>
    tpu.vector_store %arg4[%c0_18, %c0_19, %c0_20, %c0_21], %43 {strides = array<i32>} : memref<1x4x8x8xf32, #tpu.memory_space<vmem>>, vector<1x1x8x8xf32>,
    %c0_22 = arith.constant 0 : index
    %c8 = arith.constant 8 : index
    %44 = vector.load %arg5[%c0_22, %c8] : memref<64x96xf32, #tpu.memory_space<vmem>>, vector<64x8xf32>
    %45 = vector.shape_cast %44 : vector<64x8xf32> to vector<8x8x8xf32>
    %46 = arith.truncf %45 : vector<8x8x8xf32> to vector<8x8x8xbf16>
    %c0_23 = arith.constant 0 : index
    %c40 = arith.constant 40 : index
    %47 = vector.load %arg5[%c0_23, %c40] : memref<64x96xf32, #tpu.memory_space<vmem>>, vector<64x8xf32>
    %48 = vector.shape_cast %47 : vector<64x8xf32> to vector<8x8x8xf32>
    %49 = arith.truncf %48 : vector<8x8x8xf32> to vector<8x8x8xbf16>
    %c0_24 = arith.constant 0 : index
    %c72 = arith.constant 72 : index
    %50 = vector.load %arg5[%c0_24, %c72] : memref<64x96xf32, #tpu.memory_space<vmem>>, vector<64x8xf32>
    %51 = vector.shape_cast %50 : vector<64x8xf32> to vector<8x8x8xf32>
    %52 = arith.truncf %51 : vector<8x8x8xf32> to vector<8x8x8xbf16>
    "tpu.trace_start"() <{level = 10 : i32, message = "gqe,gke->gqk"}> : () -> ()
    %cst_25 = arith.constant dense<0.000000e+00> : vector<8x8x8xf32>
    %53 = tpu.matmul %46, %49, %cst_25 {dimension_numbers = #tpu.dot_dimension_numbers<[2], [2], [1], [1], [0, 0, 0, 1, 1, 1], [0], [0]>} : vector<8x8x8xbf16>, vector<8x8x8xbf16>, vector<8x8x8xf32> -> vector<8x8x8xf32>
    %cst_26 = arith.constant -1.000000e+30 : f32
    "tpu.trace_stop"() : () -> ()
    %54 = vector.shape_cast %9 : vector<1x8x8xi1> to vector<1x8x8xi1>
    %55 = vector.broadcast %54 : vector<1x8x8xi1> to vector<8x8x8xi1>
    %56 = vector.broadcast %cst_26 : f32 to vector<8x8x8xf32>
    %57 = arith.select %55, %53, %56 : vector<8x8x8xi1>, vector<8x8x8xf32>
    %cst_27 = arith.constant dense<0xFF800000> : vector<8x8xf32>
    %58 = vector.multi_reduction <maximumf>, %57, %cst_27 [2] : vector<8x8x8xf32> to vector<8x8xf32>
    %59 = vector.shape_cast %58 : vector<8x8xf32> to vector<8x8x1xf32>
    %60 = vector.broadcast %59 : vector<8x8x1xf32> to vector<8x8x8xf32>
    %61 = arith.subf %57, %60 : vector<8x8x8xf32>
    %62 = math.exp %61 : vector<8x8x8xf32>
    %cst_28 = arith.constant dense<0.000000e+00> : vector<8x8xf32>
    %63 = vector.multi_reduction <add>, %62, %cst_28 [2] : vector<8x8x8xf32> to vector<8x8xf32>
    %64 = vector.shape_cast %63 : vector<8x8xf32> to vector<8x8x1xf32>
    %65 = tpu.reciprocal %64 {approx = true} : vector<8x8x1xf32> -> vector<8x8x1xf32>
    %66 = vector.broadcast %11 : vector<1x8x1xf32> to vector<8x8x1xf32>
    %67 = arith.mulf %66, %65 : vector<8x8x1xf32>
    %68 = arith.truncf %62 : vector<8x8x8xf32> to vector<8x8x8xbf16>
    "tpu.trace_start"() <{level = 10 : i32, message = "gqk,gke->gqe"}> : () -> ()
    %cst_29 = arith.constant dense<0.000000e+00> : vector<8x8x8xf32>
    %69 = tpu.matmul %68, %52, %cst_29 {dimension_numbers = #tpu.dot_dimension_numbers<[2], [1], [1], [2], [0, 0, 0, 1, 1, 2], [0], [0]>} : vector<8x8x8xbf16>, vector<8x8x8xbf16>, vector<8x8x8xf32> -> vector<8x8x8xf32>
    "tpu.trace_stop"() : () -> ()
    %70 = vector.broadcast %67 : vector<8x8x1xf32> to vector<8x8x8xf32>
    %71 = arith.mulf %69, %70 : vector<8x8x8xf32>
    %cst_30 = arith.constant dense<0.000000e+00> : vector<8x8xf32>
    %72 = vector.multi_reduction <add>, %71, %cst_30 [1] : vector<8x8x8xf32> to vector<8x8xf32>
    %c0_31 = arith.constant 0 : index
    %c1 = arith.constant 1 : index
    %c0_32 = arith.constant 0 : index
    %c0_33 = arith.constant 0 : index
    %73 = vector.load %arg4[%c0_31, %c1, %c0_32, %c0_33] : memref<1x4x8x8xf32, #tpu.memory_space<vmem>>, vector<1x1x8x8xf32>
    %74 = vector.shape_cast %73 : vector<1x1x8x8xf32> to vector<8x8xf32>
    %75 = vector.shape_cast %72 : vector<8x8xf32> to vector<1x1x8x8xf32>
    tpu.vector_store %arg4[%c0_31, %c1, %c0_32, %c0_33], %75 {strides = array<i32>} : memref<1x4x8x8xf32, #tpu.memory_space<vmem>>, vector<1x1x8x8xf32>,
    %c0_34 = arith.constant 0 : index
    %c16 = arith.constant 16 : index
    %76 = vector.load %arg5[%c0_34, %c16] : memref<64x96xf32, #tpu.memory_space<vmem>>, vector<64x8xf32>
    %77 = vector.shape_cast %76 : vector<64x8xf32> to vector<8x8x8xf32>
    %78 = arith.truncf %77 : vector<8x8x8xf32> to vector<8x8x8xbf16>
    %c0_35 = arith.constant 0 : index
    %c48 = arith.constant 48 : index
    %79 = vector.load %arg5[%c0_35, %c48] : memref<64x96xf32, #tpu.memory_space<vmem>>, vector<64x8xf32>
    %80 = vector.shape_cast %79 : vector<64x8xf32> to vector<8x8x8xf32>
    %81 = arith.truncf %80 : vector<8x8x8xf32> to vector<8x8x8xbf16>
    %c0_36 = arith.constant 0 : index
    %c80 = arith.constant 80 : index
    %82 = vector.load %arg5[%c0_36, %c80] : memref<64x96xf32, #tpu.memory_space<vmem>>, vector<64x8xf32>
    %83 = vector.shape_cast %82 : vector<64x8xf32> to vector<8x8x8xf32>
    %84 = arith.truncf %83 : vector<8x8x8xf32> to vector<8x8x8xbf16>
    "tpu.trace_start"() <{level = 10 : i32, message = "gqe,gke->gqk"}> : () -> ()
    %cst_37 = arith.constant dense<0.000000e+00> : vector<8x8x8xf32>
    %85 = tpu.matmul %78, %81, %cst_37 {dimension_numbers = #tpu.dot_dimension_numbers<[2], [2], [1], [1], [0, 0, 0, 1, 1, 1], [0], [0]>} : vector<8x8x8xbf16>, vector<8x8x8xbf16>, vector<8x8x8xf32> -> vector<8x8x8xf32>
    %cst_38 = arith.constant -1.000000e+30 : f32
    "tpu.trace_stop"() : () -> ()
    %86 = vector.shape_cast %9 : vector<1x8x8xi1> to vector<1x8x8xi1>
    %87 = vector.broadcast %86 : vector<1x8x8xi1> to vector<8x8x8xi1>
    %88 = vector.broadcast %cst_38 : f32 to vector<8x8x8xf32>
    %89 = arith.select %87, %85, %88 : vector<8x8x8xi1>, vector<8x8x8xf32>
    %cst_39 = arith.constant dense<0xFF800000> : vector<8x8xf32>
    %90 = vector.multi_reduction <maximumf>, %89, %cst_39 [2] : vector<8x8x8xf32> to vector<8x8xf32>
    %91 = vector.shape_cast %90 : vector<8x8xf32> to vector<8x8x1xf32>
    %92 = vector.broadcast %91 : vector<8x8x1xf32> to vector<8x8x8xf32>
    %93 = arith.subf %89, %92 : vector<8x8x8xf32>
    %94 = math.exp %93 : vector<8x8x8xf32>
    %cst_40 = arith.constant dense<0.000000e+00> : vector<8x8xf32>
    %95 = vector.multi_reduction <add>, %94, %cst_40 [2] : vector<8x8x8xf32> to vector<8x8xf32>
    %96 = vector.shape_cast %95 : vector<8x8xf32> to vector<8x8x1xf32>
    %97 = tpu.reciprocal %96 {approx = true} : vector<8x8x1xf32> -> vector<8x8x1xf32>
    %98 = vector.broadcast %11 : vector<1x8x1xf32> to vector<8x8x1xf32>
    %99 = arith.mulf %98, %97 : vector<8x8x1xf32>
    %100 = arith.truncf %94 : vector<8x8x8xf32> to vector<8x8x8xbf16>
    "tpu.trace_start"() <{level = 10 : i32, message = "gqk,gke->gqe"}> : () -> ()
    %cst_41 = arith.constant dense<0.000000e+00> : vector<8x8x8xf32>
    %101 = tpu.matmul %100, %84, %cst_41 {dimension_numbers = #tpu.dot_dimension_numbers<[2], [1], [1], [2], [0, 0, 0, 1, 1, 2], [0], [0]>} : vector<8x8x8xbf16>, vector<8x8x8xbf16>, vector<8x8x8xf32> -> vector<8x8x8xf32>
    "tpu.trace_stop"() : () -> ()
    %102 = vector.broadcast %99 : vector<8x8x1xf32> to vector<8x8x8xf32>
    %103 = arith.mulf %101, %102 : vector<8x8x8xf32>
    %cst_42 = arith.constant dense<0.000000e+00> : vector<8x8xf32>
    %104 = vector.multi_reduction <add>, %103, %cst_42 [1] : vector<8x8x8xf32> to vector<8x8xf32>
    %c0_43 = arith.constant 0 : index
    %c2 = arith.constant 2 : index
    %c0_44 = arith.constant 0 : index
    %c0_45 = arith.constant 0 : index
    %105 = vector.load %arg4[%c0_43, %c2, %c0_44, %c0_45] : memref<1x4x8x8xf32, #tpu.memory_space<vmem>>, vector<1x1x8x8xf32>
    %106 = vector.shape_cast %105 : vector<1x1x8x8xf32> to vector<8x8xf32>
    %107 = vector.shape_cast %104 : vector<8x8xf32> to vector<1x1x8x8xf32>
    tpu.vector_store %arg4[%c0_43, %c2, %c0_44, %c0_45], %107 {strides = array<i32>} : memref<1x4x8x8xf32, #tpu.memory_space<vmem>>, vector<1x1x8x8xf32>,
    %c0_46 = arith.constant 0 : index
    %c24 = arith.constant 24 : index
    %108 = vector.load %arg5[%c0_46, %c24] : memref<64x96xf32, #tpu.memory_space<vmem>>, vector<64x8xf32>
    %109 = vector.shape_cast %108 : vector<64x8xf32> to vector<8x8x8xf32>
    %110 = arith.truncf %109 : vector<8x8x8xf32> to vector<8x8x8xbf16>
    %c0_47 = arith.constant 0 : index
    %c56 = arith.constant 56 : index
    %111 = vector.load %arg5[%c0_47, %c56] : memref<64x96xf32, #tpu.memory_space<vmem>>, vector<64x8xf32>
    %112 = vector.shape_cast %111 : vector<64x8xf32> to vector<8x8x8xf32>
    %113 = arith.truncf %112 : vector<8x8x8xf32> to vector<8x8x8xbf16>
    %c0_48 = arith.constant 0 : index
    %c88 = arith.constant 88 : index
    %114 = vector.load %arg5[%c0_48, %c88] : memref<64x96xf32, #tpu.memory_space<vmem>>, vector<64x8xf32>
    %115 = vector.shape_cast %114 : vector<64x8xf32> to vector<8x8x8xf32>
    %116 = arith.truncf %115 : vector<8x8x8xf32> to vector<8x8x8xbf16>
    "tpu.trace_start"() <{level = 10 : i32, message = "gqe,gke->gqk"}> : () -> ()
    %cst_49 = arith.constant dense<0.000000e+00> : vector<8x8x8xf32>
    %117 = tpu.matmul %110, %113, %cst_49 {dimension_numbers = #tpu.dot_dimension_numbers<[2], [2], [1], [1], [0, 0, 0, 1, 1, 1], [0], [0]>} : vector<8x8x8xbf16>, vector<8x8x8xbf16>, vector<8x8x8xf32> -> vector<8x8x8xf32>
    %cst_50 = arith.constant -1.000000e+30 : f32
    "tpu.trace_stop"() : () -> ()
    %118 = vector.shape_cast %9 : vector<1x8x8xi1> to vector<1x8x8xi1>
    %119 = vector.broadcast %118 : vector<1x8x8xi1> to vector<8x8x8xi1>
    %120 = vector.broadcast %cst_50 : f32 to vector<8x8x8xf32>
    %121 = arith.select %119, %117, %120 : vector<8x8x8xi1>, vector<8x8x8xf32>
    %cst_51 = arith.constant dense<0xFF800000> : vector<8x8xf32>
    %122 = vector.multi_reduction <maximumf>, %121, %cst_51 [2] : vector<8x8x8xf32> to vector<8x8xf32>
    %123 = vector.shape_cast %122 : vector<8x8xf32> to vector<8x8x1xf32>
    %124 = vector.broadcast %123 : vector<8x8x1xf32> to vector<8x8x8xf32>
    %125 = arith.subf %121, %124 : vector<8x8x8xf32>
    %126 = math.exp %125 : vector<8x8x8xf32>
    %cst_52 = arith.constant dense<0.000000e+00> : vector<8x8xf32>
    %127 = vector.multi_reduction <add>, %126, %cst_52 [2] : vector<8x8x8xf32> to vector<8x8xf32>
    %128 = vector.shape_cast %127 : vector<8x8xf32> to vector<8x8x1xf32>
    %129 = tpu.reciprocal %128 {approx = true} : vector<8x8x1xf32> -> vector<8x8x1xf32>
    %130 = vector.broadcast %11 : vector<1x8x1xf32> to vector<8x8x1xf32>
    %131 = arith.mulf %130, %129 : vector<8x8x1xf32>
    %132 = arith.truncf %126 : vector<8x8x8xf32> to vector<8x8x8xbf16>
    "tpu.trace_start"() <{level = 10 : i32, message = "gqk,gke->gqe"}> : () -> ()
    %cst_53 = arith.constant dense<0.000000e+00> : vector<8x8x8xf32>
    %133 = tpu.matmul %132, %116, %cst_53 {dimension_numbers = #tpu.dot_dimension_numbers<[2], [1], [1], [2], [0, 0, 0, 1, 1, 2], [0], [0]>} : vector<8x8x8xbf16>, vector<8x8x8xbf16>, vector<8x8x8xf32> -> vector<8x8x8xf32>
    "tpu.trace_stop"() : () -> ()
    %134 = vector.broadcast %131 : vector<8x8x1xf32> to vector<8x8x8xf32>
    %135 = arith.mulf %133, %134 : vector<8x8x8xf32>
    %cst_54 = arith.constant dense<0.000000e+00> : vector<8x8xf32>
    %136 = vector.multi_reduction <add>, %135, %cst_54 [1] : vector<8x8x8xf32> to vector<8x8xf32>
    %c0_55 = arith.constant 0 : index
    %c3 = arith.constant 3 : index
    %c0_56 = arith.constant 0 : index
    %c0_57 = arith.constant 0 : index
    %137 = vector.load %arg4[%c0_55, %c3, %c0_56, %c0_57] : memref<1x4x8x8xf32, #tpu.memory_space<vmem>>, vector<1x1x8x8xf32>
    %138 = vector.shape_cast %137 : vector<1x1x8x8xf32> to vector<8x8xf32>
    %139 = vector.shape_cast %136 : vector<8x8xf32> to vector<1x1x8x8xf32>
    tpu.vector_store %arg4[%c0_55, %c3, %c0_56, %c0_57], %139 {strides = array<i32>} : memref<1x4x8x8xf32, #tpu.memory_space<vmem>>, vector<1x1x8x8xf32>,
    return
  }
  func.func @transform_0(%arg0: i32) -> (i32, i32, i32) {
    %c0_i32 = arith.constant 0 : i32
    %c0_i32_0 = arith.constant 0 : i32
    %c0_i32_1 = arith.constant 0 : i32
    return %arg0, %c0_i32, %c0_i32_0 : i32, i32, i32
  }
  func.func @transform_1(%arg0: i32) -> (i32, i32) {
    %c0_i32 = arith.constant 0 : i32
    %c0_i32_0 = arith.constant 0 : i32
    %c0_i32_1 = arith.constant 0 : i32
    return %c0_i32, %c0_i32_0 : i32, i32
  }
  func.func @transform_2(%arg0: i32) -> (i32, i32) {
    %c0_i32 = arith.constant 0 : i32
    %c0_i32_0 = arith.constant 0 : i32
    %c0_i32_1 = arith.constant 0 : i32
    return %c0_i32, %c0_i32_0 : i32, i32
  }
  func.func @transform_3(%arg0: i32) -> (i32, i32, i32, i32) {
    %c0_i32 = arith.constant 0 : i32
    %c0_i32_0 = arith.constant 0 : i32
    %c0_i32_1 = arith.constant 0 : i32
    %c0_i32_2 = arith.constant 0 : i32
    return %arg0, %c0_i32, %c0_i32_0, %c0_i32_1 : i32, i32, i32, i32
  }
}

</mosaic_0001>

<bundles_post_ra>
// kernel: tpu_custom_call.1
= control target key start
LH: loop header
LB: loop body
LE: loop exit
PB: predicated region body
PF: predicated region fallthrough
CT: control target
= control target key end

     0   :  { %vm44_vm0 = vcmask 261120   ;;  %s6197_s0 = inlined_call_operand.vmem [shape: f32[1,64,32], index: 0, kind: input, shape index: {}]   ;;  %s6198_s1 = inlined_call_operand.vmem [shape: bf16[32,96], index: 1, kind: input, shape index: {}]   ;;  %s6199_s2 = inlined_call_operand.vmem [shape: f32[8,1], index: 2, kind: input, shape index: {}]   ;;  %s6200_s3 = inlined_call_operand.hbm [shape: f32[1,4,8,8], index: 3, kind: output, shape index: {}]  }
   0x1   :  { %v4902_v0 = vld [vmem:[%s6198_s1] sm:$0xff]   ;;  %v4903_v1 = vld [vmem:[%s6198_s1 + $0x8] sm:$0xff]   ;;  %v18_v5 = vld [vmem:[%s6197_s0 + $0x10] sm:$0xff] }
   0x2   :  { %4487 = vmatprep.subr.bf16.mxu0 %v4902_v0  ;;  %v16_v2 = vld [vmem:[%s6197_s0] sm:$0xff]  ;;  %v17_v3 = vld [vmem:[%s6197_s0 + $0x8] sm:$0xff]  ;;  %v19_v6 = vld [vmem:[%s6197_s0 + $0x18] sm:$0xff] }
   0x3   :  { %4488 = vmatpush3.bf16.msra.mxu0 %v4902_v0  ;;  %v24_v4 = vpack.c.bf16 %v17_v3, %v16_v2  ;;  %v20_v7 = vld [vmem:[%s6197_s0 + $0x20] sm:$0xff]  ;;  %v21_v8 = vld [vmem:[%s6197_s0 + $0x28] sm:$0xff] }
   0x4   :  { %4489 = vmatprep.subr.bf16.mxu0 %v4903_v1 }
   0x5   :  { %8 = vsyncpa [#allocation4], 0  ;;  %4491 = vmatprep.mubr.msk.bf16.mxu0 %vm44_vm0, %v24_v4  ;;  %v25_v9 = vpack.c.bf16 %v19_v6, %v18_v5  ;;  %v26_v10 = vpack.c.bf16 %v21_v8, %v20_v7  ;;  %v22_v11 = vld [vmem:[%s6197_s0 + $0x30] sm:$0xff]  ;;  %v23_v12 = vld [vmem:[%s6197_s0 + $0x38] sm:$0xff]  ;;  %vm122_vm1 = vcmask 785408   ;;  %v6201_v14 = vmov 0.0  }
   0x6   :  { %v27_v13 = vpack.c.bf16 %v23_v12, %v22_v11  ;;  %4499 = vmatprep.subr.bf16.mxu1 %v6201_v14  ;;  %vm5057_vm2 = vmmov 0   ;;  %s5058_s0 = smov 96   ;;  %s5059_s4 = smov 64   ;;  %vm156_vm3 = vcmask 64512   ;;  %vm657_vm4 = vcmask 1043456  }
   0x7   :  { %4490 = vmatpush3.bf16.msra.mxu0 %v4903_v1  ;;  %4501 = vmatprep.mubr.msk.bf16.mxu1 %vm5057_vm2, %v6201_v14  ;;  %v131_v59 = vlaneseq  ;;  %s5060_s5 = smov 88   ;;  %s5061_s6 = smov 120   ;;  %vm1149_vm6 = vcmask 1041409   ;;  %vm1151_vm7 = vcmask 1042434   ;;  %vm1153_vm8 = vcmask 1043459  }
   0x8   :  { %4511 = vmatprep.subr.bf16.mxu0 %v6201_v14  ;;  %s5062_s7 = smov 56   ;;  %s5063_s8 = smov 80   ;;  %vm1155_vm9 = vcmask 1044484   ;;  %vm1157_vm10 = vcmask 1045509   ;;  %vm1159_vm11 = vcmask 1046534   ;;  %vm1161_vm12 = vcmask 1047559  }
   0x9   :  { %v132_v60 = vshrl.u32 %v131_v59, 7  ;;  %v134_v61 = vand.u32 127, %v131_v59  ;;  %s5064_s9 = smov 112   ;;  %s5065_s10 = smov 48  }
   0xa   :  { %4492 = vmatmul.mubr.msk.bf16.vlgmr.msra.gmra.mrb[0].mxu0 %vm44_vm0, %v25_v9  ;;  %s5066_s11 = smov 72   ;;  %s5067_s12 = smov 104  }
   0xb   :  { %4495 = vmatprep.mubr.msk.bf16.mxu0 %vm44_vm0, %v26_v10  ;;  %vm5227_vm5 = vcmp.ge.s32.totalorder %v132_v60, %v134_v61  ;;  %s5068_s13 = smov 40  }
  0x12   :  { %4496 = vmatmul.mubr.msk.bf16.gmra.mrb[4].mxu0 %vm44_vm0, %v27_v13 }
  0x13   :  { %4513 = vmatprep.mubr.msk.bf16.mxu0 %vm5057_vm2, %v6201_v14 }
  0xdd   :  { %v4493_v15 = vpop.f32.mrb[0].mxu0 }
  0xde   :  { %125 = vst.msk [vmem:[#allocation2 + $0x10] sm:$0xff] %vm122_vm1, %v4493_v15  ;;  %v91_v16 = vpop.f32.mrb[1].mxu0 }
  0xdf   :  { %123 = vst.msk [vmem:[#allocation2] sm:$0xff] %vm122_vm1, %v91_v16  ;;  %v4494_v17 = vpop.f32.mrb[2].mxu0 }
  0xe0   :  { %126 = vst.msk [vmem:[#allocation2 + $0x18] sm:$0xff] %vm122_vm1, %v4494_v17  ;;  %v94_v18 = vpop.f32.mrb[3].mxu0 }
  0xe1   :  { %124 = vst.msk [vmem:[#allocation2 + $0x8] sm:$0xff] %vm122_vm1, %v94_v18 }
  0xe5   :  { %v4497_v19 = vpop.f32.mrb[4].mxu0  ;;  %v139_v20 = vld [vmem:[#allocation2 + $0x10] sm:$0xff] }
  0xe6   :  { %129 = vst.msk [vmem:[#allocation2 + $0x30] sm:$0xff] %vm122_vm1, %v4497_v19  ;;  %v107_v21 = vpop.f32.mrb[5].mxu0  ;;  %v5138_v22 = vpack.c.bf16 %v139_v20, %v139_v20  ;;  %v137_v23 = vld [vmem:[#allocation2] sm:$0xff] }
  0xe7   :  { %127 = vst.msk [vmem:[#allocation2 + $0x20] sm:$0xff] %vm122_vm1, %v107_v21  ;;  %v4498_v24 = vpop.f32.mrb[6].mxu0  ;;  %v5141_v25 = vpack.c.bf16 %v137_v23, %v137_v23  ;;  %v140_v26 = vld [vmem:[#allocation2 + $0x18] sm:$0xff] }
  0xe8   :  { %130 = vst.msk [vmem:[#allocation2 + $0x38] sm:$0xff] %vm122_vm1, %v4498_v24  ;;  %253 = vrot.lane.b32.xlu1 %v5138_v22, %s5058_s0  ;;  %v110_v27 = vpop.f32.mrb[7].mxu0  ;;  %v138_v28 = vld [vmem:[#allocation2 + $0x8] sm:$0xff]  ;;  %v5147_v29 = vpack.c.bf16 %v140_v26, %v140_v26 }
  0xe9   :  { %128 = vst.msk [vmem:[#allocation2 + $0x28] sm:$0xff] %vm122_vm1, %v110_v27  ;;  %154 = vrot.lane.b32.xlu0 %v5141_v25, %s5058_s0  ;;  %v5149_v30 = vpack.c.bf16 %v138_v28, %v138_v28 }
  0xec   :  { %302 = vrot.lane.b32.xlu1 %v5147_v29, %s5058_s0 }
  0xed   :  { %204 = vrot.lane.b32.xlu0 %v5149_v30, %s5058_s0  ;;  %v143_v32 = vld [vmem:[#allocation2 + $0x30] sm:$0xff] }
  0xee   :  { %v141_v31 = vld [vmem:[#allocation2 + $0x20] sm:$0xff]  ;;  %v5158_v37 = vpack.c.bf16 %v143_v32, %v143_v32 }
  0xef   :  { %v5153_v33 = vpack.c.bf16 %v141_v31, %v141_v31  ;;  %v144_v35 = vld [vmem:[#allocation2 + $0x38] sm:$0xff] }
  0xf0   :  { %v142_v34 = vld [vmem:[#allocation2 + $0x28] sm:$0xff]  ;;  %v5161_v38 = vpack.c.bf16 %v144_v35, %v144_v35 }
  0xf1   :  { %351 = vrot.lane.b32.xlu0 %v5153_v33, %s5058_s0  ;;  %v5156_v36 = vpack.c.bf16 %v142_v34, %v142_v34 }
  0xf3   :  { %400 = vrot.lane.b32.xlu1 %v5156_v36, %s5058_s0 }
  0xf5   :  { %449 = vrot.lane.b32.xlu0 %v5158_v37, %s5058_s0 }
  0xf7   :  { %498 = vrot.lane.b32.xlu1 %v5161_v38, %s5058_s0 }
  0xf9   :  { %701 = vrot.lane.b32.xlu0 %v5149_v30, %s5059_s4 }
  0xfb   :  { %652 = vrot.lane.b32.xlu1 %v5141_v25, %s5059_s4 }
  0xfd   :  { %845 = vrot.lane.b32.xlu0 %v5153_v33, %s5059_s4 }
  0xff   :  { %749 = vrot.lane.b32.xlu1 %v5138_v22, %s5059_s4 }
 0x103   :  { %797 = vrot.lane.b32.xlu1 %v5147_v29, %s5059_s4 }
 0x15a   :  { %v254_v39 = vpop.permute.xlu1 %253 }
 0x15b   :  { %v259_v40 = vsel %vm156_vm3, %v254_v39, 0  ;;  %v155_v41 = vpop.permute.xlu0 %154 }
 0x15c   :  { %4512 = vmatpush3.bf16.xpose.msra.mxu0 %v259_v40  ;;  %v161_v42 = vsel %vm156_vm3, %v155_v41, 0 }
 0x15d   :  { %4500 = vmatpush3.bf16.xpose.msra.mxu1 %v161_v42  ;;  %4523 = vmatprep.subr.bf16.mxu0 %v6201_v14 }
 0x15e   :  { %4505 = vmatprep.subr.bf16.mxu1 %v6201_v14  ;;  %v303_v44 = vpop.permute.xlu1 %302 }
 0x15f   :  { %v205_v43 = vpop.permute.xlu0 %204  ;;  %v308_v52 = vsel %vm156_vm3, %v303_v44, 0 }
 0x160   :  { %v210_v46 = vsel %vm156_vm3, %v205_v43, 0 }
 0x163   :  { %4514 = vmatmul.mubr.msk.bf16.vlgmr.msra.gmra.mrb[8].mxu0 %vm156_vm3, %v5138_v22  ;;  %v352_v45 = vpop.permute.xlu0 %351 }
 0x164   :  { %v357_v47 = vsel %vm156_vm3, %v352_v45, 0  ;;  %4502 = vmatmul.mubr.msk.bf16.vlgmr.msra.gmra.mrb[0].mxu1 %vm156_vm3, %v5141_v25  ;;  %4525 = vmatprep.mubr.msk.bf16.mxu0 %vm5057_vm2, %v6201_v14 }
 0x165   :  { %4506 = vmatpush3.bf16.xpose.msra.mxu1 %v210_v46  ;;  %4524 = vmatpush3.bf16.xpose.msra.mxu0 %v357_v47  ;;  %v401_v48 = vpop.permute.xlu1 %400 }
 0x166   :  { %4507 = vmatprep.mubr.msk.bf16.mxu1 %vm5057_vm2, %v6201_v14  ;;  %4517 = vmatprep.subr.bf16.mxu1 %v6201_v14  ;;  %v406_v54 = vsel %vm156_vm3, %v401_v48, 0 }
 0x167   :  { %4535 = vmatprep.subr.bf16.mxu0 %v6201_v14  ;;  %v450_v49 = vpop.permute.xlu0 %449 }
 0x168   :  { %v455_v50 = vsel %vm156_vm3, %v450_v49, 0 }
 0x169   :  { %v499_v51 = vpop.permute.xlu1 %498 }
 0x16a   :  { %v504_v56 = vsel %vm156_vm3, %v499_v51, 0 }
 0x16b   :  { %v702_v57 = vpop.permute.xlu0 %701 }
 0x16c   :  { %4508 = vmatmul.mubr.msk.bf16.vlgmr.msra.gmra.mrb[4].mxu1 %vm156_vm3, %v5149_v30  ;;  %4526 = vmatmul.mubr.msk.bf16.vlgmr.msra.gmra.mrb[12].mxu0 %vm156_vm3, %v5153_v33  ;;  %v707_v58 = vsel %vm657_vm4, %v702_v57, 0 }
 0x16d   :  { %4518 = vmatpush3.bf16.xpose.msra.mxu1 %v308_v52  ;;  %4536 = vmatpush3.bf16.xpose.msra.mxu0 %v455_v50  ;;  %v653_v53 = vpop.permute.xlu1 %652 }
 0x16e   :  { %4519 = vmatprep.mubr.msk.bf16.mxu1 %vm5057_vm2, %v6201_v14  ;;  %4537 = vmatprep.mubr.msk.bf16.mxu0 %vm5057_vm2, %v6201_v14  ;;  %v659_v55 = vsel %vm657_vm4, %v653_v53, 0 }
 0x16f   :  { %4529 = vmatprep.subr.bf16.mxu1 %v6201_v14  ;;  %4547 = vmatprep.subr.bf16.mxu0 %v6201_v14 }
 0x171   :  { %v750_v57 = vpop.permute.xlu1 %749 }
 0x174   :  { %4520 = vmatmul.mubr.msk.bf16.vlgmr.msra.gmra.mrb[8].mxu1 %vm156_vm3, %v5147_v29  ;;  %4538 = vmatmul.mubr.msk.bf16.vlgmr.msra.gmra.mrb[16].mxu0 %vm156_vm3, %v5158_v37 }
 0x175   :  { %4530 = vmatpush3.bf16.xpose.msra.mxu1 %v406_v54  ;;  %4548 = vmatpush3.bf16.msra.mxu0 %v659_v55  ;;  %v798_v60 = vpop.permute.xlu1 %797 }
 0x176   :  { %4531 = vmatprep.mubr.msk.bf16.mxu1 %vm5057_vm2, %v6201_v14  ;;  %4541 = vmatprep.subr.bf16.mxu1 %v6201_v14 }
 0x177   :  { %4549 = vmatprep.mubr.msk.bf16.mxu0 %vm5057_vm2, %v6201_v14  ;;  %4559 = vmatprep.subr.bf16.mxu0 %v6201_v14 }
 0x17c   :  { %4532 = vmatmul.mubr.msk.bf16.vlgmr.msra.gmra.mrb[12].mxu1 %vm156_vm3, %v5156_v36 }
 0x17d   :  { %4542 = vmatpush3.bf16.xpose.msra.mxu1 %v504_v56  ;;  %4543 = vmatprep.mubr.msk.bf16.mxu1 %vm5057_vm2, %v6201_v14  ;;  %v846_v56 = vpop.permute.xlu0 %845 }
 0x17e   :  { %4553 = vmatprep.subr.bf16.mxu1 %v6201_v14 }
 0x184   :  { %4544 = vmatmul.mubr.msk.bf16.vlgmr.msra.gmra.mrb[16].mxu1 %vm156_vm3, %v5161_v38 }
 0x185   :  { %4554 = vmatpush3.bf16.msra.mxu1 %v707_v58  ;;  %4555 = vmatprep.mubr.msk.bf16.mxu1 %vm5057_vm2, %v6201_v14 }
 0x186   :  { %4565 = vmatprep.subr.bf16.mxu1 %v6201_v14 }
 0x236   :  { %v295_v63 = vpop.f32.mrb[8].mxu0 }
 0x237   :  { %v5233_v0 = vsel %vm5227_vm5, %v295_v63, -1e+30  ;;  %v197_v1 = vpop.f32.mrb[0].mxu1  ;;  %v4515_v2 = vpop.f32.mrb[9].mxu0 }
 0x238   :  { %v4503_v3 = vpop.f32.mrb[1].mxu1  ;;  %v298_v4 = vpop.f32.mrb[10].mxu0  ;;  %v562_v5 = vsel %vm156_vm3, %v5233_v0, -inf  ;;  %v5239_v6 = vsel %vm5227_vm5, %v197_v1, -1e+30 }
 0x239   :  { %v200_v7 = vpop.f32.mrb[2].mxu1  ;;  %563 = vmax.xlane.f32.xlu0 %v562_v5  ;;  %v4516_v8 = vpop.f32.mrb[11].mxu0  ;;  %v556_v10 = vsel %vm156_vm3, %v5239_v6, -inf }
 0x23a   :  { %v4504_v9 = vpop.f32.mrb[3].mxu1 }
 0x23d   :  { %557 = vmax.xlane.f32.xlu0 %v556_v10 }
 0x23f   :  { %v246_v11 = vpop.f32.mrb[4].mxu1  ;;  %v393_v12 = vpop.f32.mrb[12].mxu0 }
 0x240   :  { %v5245_v13 = vsel %vm5227_vm5, %v246_v11, -1e+30  ;;  %v4509_v15 = vpop.f32.mrb[5].mxu1  ;;  %v4527_v16 = vpop.f32.mrb[13].mxu0  ;;  %v5267_v50 = vsel %vm5227_vm5, %v393_v12, -1e+30 }
 0x241   :  { %v249_v17 = vpop.f32.mrb[6].mxu1  ;;  %v396_v18 = vpop.f32.mrb[14].mxu0  ;;  %v559_v19 = vsel %vm156_vm3, %v5245_v13, -inf  ;;  %v568_v51 = vsel %vm156_vm3, %v5267_v50, -inf }
 0x242   :  { %v4510_v20 = vpop.f32.mrb[7].mxu1  ;;  %v4528_v21 = vpop.f32.mrb[15].mxu0  ;;  %560 = vmax.xlane.f32.xlu1 %v559_v19  ;;  %v803_v17 = vsel %vm657_vm4, %v798_v60, 0 }
 0x243   :  { %v851_v20 = vsel %vm657_vm4, %v846_v56, 0 }
 0x247   :  { %v344_v23 = vpop.f32.mrb[8].mxu1  ;;  %v491_v24 = vpop.f32.mrb[16].mxu0 }
 0x248   :  { %v5251_v26 = vsel %vm5227_vm5, %v344_v23, -1e+30  ;;  %v4521_v27 = vpop.f32.mrb[9].mxu1  ;;  %v4539_v28 = vpop.f32.mrb[17].mxu0  ;;  %v5273_v52 = vsel %vm5227_vm5, %v491_v24, -1e+30 }
 0x249   :  { %v347_v31 = vpop.f32.mrb[10].mxu1  ;;  %v494_v32 = vpop.f32.mrb[18].mxu0  ;;  %v565_v34 = vsel %vm156_vm3, %v5251_v26, -inf  ;;  %v574_v53 = vsel %vm156_vm3, %v5273_v52, -inf }
 0x24a   :  { %v4522_v35 = vpop.f32.mrb[11].mxu1  ;;  %566 = vmax.xlane.f32.xlu0 %v565_v34  ;;  %v4540_v39 = vpop.f32.mrb[19].mxu0 }
 0x24f   :  { %v442_v40 = vpop.f32.mrb[12].mxu1 }
 0x250   :  { %v5257_v41 = vsel %vm5227_vm5, %v442_v40, -1e+30  ;;  %v4533_v42 = vpop.f32.mrb[13].mxu1 }
 0x251   :  { %v445_v43 = vpop.f32.mrb[14].mxu1  ;;  %v571_v44 = vsel %vm156_vm3, %v5257_v41, -inf }
 0x252   :  { %572 = vmax.xlane.f32.xlu0 %v571_v44  ;;  %v4534_v45 = vpop.f32.mrb[15].mxu1 }
 0x253   :  { %893 = vrot.lane.b32.xlu1 %v5156_v36, %s5059_s4 }
 0x257   :  { %v540_v46 = vpop.f32.mrb[16].mxu1 }
 0x258   :  { %v4545_v47 = vpop.f32.mrb[17].mxu1  ;;  %v5279_v54 = vsel %vm5227_vm5, %v540_v46, -1e+30 }
 0x259   :  { %v543_v48 = vpop.f32.mrb[18].mxu1  ;;  %v577_v55 = vsel %vm156_vm3, %v5279_v54, -inf }
 0x25a   :  { %v4546_v49 = vpop.f32.mrb[19].mxu1 }
 0x268   :  { %941 = vrot.lane.b32.xlu0 %v5158_v37, %s5059_s4 }
 0x277   :  { %569 = vmax.xlane.f32.xlu1 %v568_v51 }
 0x27b   :  { %575 = vmax.xlane.f32.xlu1 %v574_v53 }
 0x287   :  { %578 = vmax.xlane.f32.xlu0 %v577_v55 }
 0x28c   :  { %989 = vrot.lane.b32.xlu1 %v5161_v38, %s5059_s4 }
 0x290   :  { %1235 = vrot.lane.b32.xlu1 %v5149_v30, %s5060_s5 }
 0x294   :  { %1286 = vrot.lane.b32.xlu1 %v5138_v22, %s5060_s5 }
 0x298   :  { %1337 = vrot.lane.b32.xlu1 %v5147_v29, %s5060_s5 }
 0x29c   :  { %1388 = vrot.lane.b32.xlu1 %v5153_v33, %s5060_s5 }
 0x29d   :  { %1184 = vrot.lane.b32.xlu0 %v5141_v25, %s5060_s5 }
 0x2a0   :  { %1439 = vrot.lane.b32.xlu1 %v5156_v36, %s5060_s5 }
 0x2a1   :  { %1182 = vrot.lane.b32.xlu0 %v5141_v25, %s5061_s6 }
 0x2a4   :  { %1490 = vrot.lane.b32.xlu1 %v5158_v37, %s5060_s5 }
 0x2a5   :  { %1233 = vrot.lane.b32.xlu0 %v5149_v30, %s5061_s6 }
 0x2a8   :  { %1541 = vrot.lane.b32.xlu1 %v5161_v38, %s5060_s5 }
 0x2a9   :  { %1284 = vrot.lane.b32.xlu0 %v5138_v22, %s5061_s6 }
 0x2ac   :  { %1539 = vrot.lane.b32.xlu1 %v5161_v38, %s5061_s6 }
 0x2ad   :  { %1335 = vrot.lane.b32.xlu0 %v5147_v29, %s5061_s6 }
 0x2b0   :  { %1693 = vrot.lane.b32.xlu1 %v5141_v25, %s5062_s7 }
 0x2b1   :  { %1386 = vrot.lane.b32.xlu0 %v5153_v33, %s5061_s6 }
 0x2b4   :  { %1789 = vrot.lane.b32.xlu1 %v5138_v22, %s5062_s7 }
 0x2b5   :  { %1437 = vrot.lane.b32.xlu0 %v5156_v36, %s5061_s6 }
 0x2b8   :  { %1837 = vrot.lane.b32.xlu1 %v5147_v29, %s5062_s7 }
 0x2b9   :  { %1488 = vrot.lane.b32.xlu0 %v5158_v37, %s5061_s6 }
 0x2bc   :  { %1933 = vrot.lane.b32.xlu1 %v5156_v36, %s5062_s7 }
 0x2bd   :  { %1741 = vrot.lane.b32.xlu0 %v5149_v30, %s5062_s7 }
 0x2c1   :  { %1885 = vrot.lane.b32.xlu0 %v5153_v33, %s5062_s7 }
 0x2c6   :  { %v564_v58 = vpop.xlane.xlu0 %563 }
 0x2c7   :  { %v582_v63 = vsub.f32 %v5233_v0, %v564_v58  ;;  %v755_v0 = vsel %vm657_vm4, %v750_v57, 0 }
 0x2c9   :  { %v592_v4 = vmul.f32 1.442695, %v582_v63 }
 0x2ca   :  { %v558_v59 = vpop.xlane.xlu0 %557 }
 0x2cb   :  { %v580_v61 = vsub.f32 %v5239_v6, %v558_v59 }
 0x2cd   :  { %v588_v1 = vmul.f32 1.442695, %v580_v61 }
 0x2cf   :  { %4904 = vpow2.f32 %v588_v1  ;;  %v561_v2 = vpop.xlane.xlu1 %560 }
 0x2d0   :  { %v581_v3 = vsub.f32 %v5245_v13, %v561_v2 }
 0x2d2   :  { %v590_v5 = vmul.f32 1.442695, %v581_v3 }
 0x2d3   :  { %v894_v23 = vpop.permute.xlu1 %893 }
 0x2d4   :  { %4906 = vpow2.f32 %v590_v5 }
 0x2d5   :  { %4908 = vpow2.f32 %v592_v4 }
 0x2d7   :  { %v567_v7 = vpop.xlane.xlu0 %566 }
 0x2d8   :  { %v583_v8 = vsub.f32 %v5251_v26, %v567_v7  ;;  %v899_v26 = vsel %vm657_vm4, %v894_v23, 0 }
 0x2d9   :  { %v5317_v9 = vpop.eup %4904 }
 0x2da   :  { %v594_v10 = vmul.f32 1.442695, %v583_v8  ;;  %v644_v6 = vpack.c.bf16 %v5317_v9, %v5317_v9 }
 0x2dc   :  { %4910 = vpow2.f32 %v594_v10  ;;  %4550 = vmatmul.mubr.msk.bf16.vlgmr.msra.gmra.mrb[20].mxu0 %vm156_vm3, %v644_v6 }
 0x2dd   :  { %4560 = vmatpush3.bf16.msra.mxu0 %v755_v0  ;;  %4561 = vmatprep.mubr.msk.bf16.mxu0 %vm5057_vm2, %v6201_v14 }
 0x2de   :  { %v5325_v11 = vpop.eup %4906  ;;  %4571 = vmatprep.subr.bf16.mxu0 %v6201_v14 }
 0x2df   :  { %v5328_v12 = vpop.eup %4908  ;;  %v573_v13 = vpop.xlane.xlu0 %572  ;;  %v645_v15 = vpack.c.bf16 %v5325_v11, %v5325_v11 }
 0x2e0   :  { %v585_v16 = vsub.f32 %v5257_v41, %v573_v13  ;;  %v646_v19 = vpack.c.bf16 %v5328_v12, %v5328_v12 }
 0x2e1   :  { %4556 = vmatmul.mubr.msk.bf16.vlgmr.msra.gmra.mrb[20].mxu1 %vm156_vm3, %v645_v15 }
 0x2e2   :  { %v598_v18 = vmul.f32 1.442695, %v585_v16  ;;  %4566 = vmatpush3.bf16.msra.mxu1 %v803_v17  ;;  %4567 = vmatprep.mubr.msk.bf16.mxu1 %vm5057_vm2, %v6201_v14 }
 0x2e3   :  { %4577 = vmatprep.subr.bf16.mxu1 %v6201_v14  ;;  %v942_v43 = vpop.permute.xlu0 %941 }
 0x2e4   :  { %4912 = vpow2.f32 %v598_v18  ;;  %4562 = vmatmul.mubr.msk.bf16.vlgmr.msra.gmra.mrb[24].mxu0 %vm156_vm3, %v646_v19 }
 0x2e5   :  { %4572 = vmatpush3.bf16.msra.mxu0 %v851_v20  ;;  %4573 = vmatprep.mubr.msk.bf16.mxu0 %vm5057_vm2, %v6201_v14 }
 0x2e6   :  { %v5344_v21 = vpop.eup %4910  ;;  %4583 = vmatprep.subr.bf16.mxu0 %v6201_v14 }
 0x2e7   :  { %v647_v24 = vpack.c.bf16 %v5344_v21, %v5344_v21 }
 0x2e9   :  { %4568 = vmatmul.mubr.msk.bf16.vlgmr.msra.gmra.mrb[24].mxu1 %vm156_vm3, %v647_v24 }
 0x2ea   :  { %4578 = vmatpush3.bf16.msra.mxu1 %v899_v26  ;;  %4579 = vmatprep.mubr.msk.bf16.mxu1 %vm5057_vm2, %v6201_v14 }
 0x2eb   :  { %4589 = vmatprep.subr.bf16.mxu1 %v6201_v14 }
 0x2ee   :  { %v5354_v27 = vpop.eup %4912 }
 0x2ef   :  { %v649_v28 = vpack.c.bf16 %v5354_v27, %v5354_v27 }
 0x2f1   :  { %4580 = vmatmul.mubr.msk.bf16.vlgmr.msra.gmra.mrb[28].mxu1 %vm156_vm3, %v649_v28 }
 0x2f2   :  { %4591 = vmatprep.mubr.msk.bf16.mxu1 %vm5057_vm2, %v6201_v14 }
 0x304   :  { %v570_v31 = vpop.xlane.xlu1 %569 }
 0x305   :  { %v584_v32 = vsub.f32 %v5267_v50, %v570_v31  ;;  %v947_v50 = vsel %vm657_vm4, %v942_v43, 0 }
 0x307   :  { %v596_v34 = vmul.f32 1.442695, %v584_v32 }
 0x308   :  { %v576_v35 = vpop.xlane.xlu1 %575 }
 0x309   :  { %4914 = vpow2.f32 %v596_v34  ;;  %v586_v39 = vsub.f32 %v5273_v52, %v576_v35 }
 0x30b   :  { %v600_v40 = vmul.f32 1.442695, %v586_v39 }
 0x30c   :  { %v990_v41 = vpop.permute.xlu1 %989 }
 0x30d   :  { %v995_v42 = vsel %vm657_vm4, %v990_v41, 0  ;;  %4916 = vpow2.f32 %v600_v40 }
 0x30e   :  { %4590 = vmatpush3.bf16.msra.mxu1 %v995_v42 }
 0x30f   :  { %4601 = vmatprep.subr.bf16.mxu1 %v6201_v14 }
 0x310   :  { %v1236_v44 = vpop.permute.xlu1 %1235 }
 0x311   :  { %v1241_v2 = vsel %vm156_vm3, %v1236_v44, 0 }
 0x313   :  { %v5365_v45 = vpop.eup %4914 }
 0x314   :  { %v579_v46 = vpop.xlane.xlu0 %578  ;;  %v1287_v47 = vpop.permute.xlu1 %1286  ;;  %v648_v48 = vpack.c.bf16 %v5365_v45, %v5365_v45 }
 0x315   :  { %v587_v49 = vsub.f32 %v5279_v54, %v579_v46  ;;  %v1292_v3 = vsel %vm156_vm3, %v1287_v47, 0 }
 0x316   :  { %4574 = vmatmul.mubr.msk.bf16.vlgmr.msra.gmra.mrb[28].mxu0 %vm156_vm3, %v648_v48 }
 0x317   :  { %v602_v51 = vmul.f32 1.442695, %v587_v49  ;;  %4584 = vmatpush3.bf16.msra.mxu0 %v947_v50  ;;  %4585 = vmatprep.mubr.msk.bf16.mxu0 %vm5057_vm2, %v6201_v14  ;;  %v5375_v55 = vpop.eup %4916 }
 0x318   :  { %v1185_v52 = vpop.permute.xlu0 %1184  ;;  %v1338_v53 = vpop.permute.xlu1 %1337  ;;  %4595 = vmatprep.subr.bf16.mxu0 %v6201_v14  ;;  %v650_v54 = vpack.c.bf16 %v5375_v55, %v5375_v55 }
 0x319   :  { %4918 = vpow2.f32 %v602_v51  ;;  %v1190_v58 = vsel %vm156_vm3, %v1185_v52, 0  ;;  %v1343_v7 = vsel %vm156_vm3, %v1338_v53, 0 }
 0x31c   :  { %v1183_v56 = vpop.permute.xlu0 %1182  ;;  %v1389_v57 = vpop.permute.xlu1 %1388 }
 0x31d   :  { %v1394_v8 = vsel %vm156_vm3, %v1389_v57, 0 }
 0x31e   :  { %4586 = vmatmul.mubr.msk.bf16.vlgmr.msra.gmra.mrb[32].mxu0 %vm156_vm3, %v650_v54 }
 0x31f   :  { %4597 = vmatprep.mubr.msk.bf16.mxu0 %vm5057_vm2, %v6201_v14 }
 0x320   :  { %4596 = vmatpush3.bf16.xpose.msra.mxu0 %v1190_v58  ;;  %v1234_v59 = vpop.permute.xlu0 %1233  ;;  %v1440_v61 = vpop.permute.xlu1 %1439 }
 0x321   :  { %4607 = vmatprep.subr.bf16.mxu0 %v6201_v14  ;;  %v1445_v0 = vsel %vm156_vm3, %v1440_v61, 0 }
 0x323   :  { %v5384_v60 = vpop.eup %4918 }
 0x324   :  { %v651_v63 = vpack.c.bf16 %v5384_v60, %v5384_v60  ;;  %v1285_v1 = vpop.permute.xlu0 %1284  ;;  %v1491_v4 = vpop.permute.xlu1 %1490 }
 0x325   :  { %v1496_v15 = vsel %vm156_vm3, %v1491_v4, 0 }
 0x326   :  { %4592 = vmatmul.mubr.msk.bf16.vlgmr.msra.gmra.mrb[32].mxu1 %vm156_vm3, %v651_v63 }
 0x327   :  { %4598 = vmatmul.mubr.msk.bf16.vlgmr.msra.gmra.mrb[36].mxu0 %vm156_vm3, %v1183_v56  ;;  %4602 = vmatpush3.bf16.xpose.msra.mxu1 %v1241_v2 }
 0x328   :  { %4608 = vmatpush3.bf16.xpose.msra.mxu0 %v1292_v3  ;;  %4603 = vmatprep.mubr.msk.bf16.mxu1 %vm5057_vm2, %v6201_v14  ;;  %v1336_v5 = vpop.permute.xlu0 %1335  ;;  %v1542_v10 = vpop.permute.xlu1 %1541 }
 0x329   :  { %4609 = vmatprep.mubr.msk.bf16.mxu0 %vm5057_vm2, %v6201_v14  ;;  %4613 = vmatprep.subr.bf16.mxu1 %v6201_v14  ;;  %v1547_v19 = vsel %vm156_vm3, %v1542_v10, 0 }
 0x32a   :  { %4619 = vmatprep.subr.bf16.mxu0 %v6201_v14 }
 0x32c   :  { %v1387_v6 = vpop.permute.xlu0 %1386  ;;  %v1540_v13 = vpop.permute.xlu1 %1539 }
 0x32e   :  { %4604 = vmatmul.mubr.msk.bf16.vlgmr.msra.gmra.mrb[36].mxu1 %vm156_vm3, %v1234_v59 }
 0x32f   :  { %4610 = vmatmul.mubr.msk.bf16.vlgmr.msra.gmra.mrb[40].mxu0 %vm156_vm3, %v1285_v1  ;;  %4614 = vmatpush3.bf16.xpose.msra.mxu1 %v1343_v7 }
 0x330   :  { %4620 = vmatpush3.bf16.xpose.msra.mxu0 %v1394_v8  ;;  %4615 = vmatprep.mubr.msk.bf16.mxu1 %vm5057_vm2, %v6201_v14  ;;  %v1438_v16 = vpop.permute.xlu0 %1437  ;;  %v1694_v17 = vpop.permute.xlu1 %1693 }
 0x331   :  { %4621 = vmatprep.mubr.msk.bf16.mxu0 %vm5057_vm2, %v6201_v14  ;;  %4625 = vmatprep.subr.bf16.mxu1 %v6201_v14  ;;  %v1699_v20 = vsel %vm657_vm4, %v1694_v17, 0 }
 0x332   :  { %4631 = vmatprep.subr.bf16.mxu0 %v6201_v14 }
 0x334   :  { %v1489_v18 = vpop.permute.xlu0 %1488 }
 0x336   :  { %4616 = vmatmul.mubr.msk.bf16.vlgmr.msra.gmra.mrb[40].mxu1 %vm156_vm3, %v1336_v5 }
 0x337   :  { %4622 = vmatmul.mubr.msk.bf16.vlgmr.msra.gmra.mrb[44].mxu0 %vm156_vm3, %v1387_v6  ;;  %4626 = vmatpush3.bf16.xpose.msra.mxu1 %v1445_v0 }
 0x338   :  { %4632 = vmatpush3.bf16.xpose.msra.mxu0 %v1496_v15  ;;  %4627 = vmatprep.mubr.msk.bf16.mxu1 %vm5057_vm2, %v6201_v14  ;;  %v1742_v23 = vpop.permute.xlu0 %1741 }
 0x339   :  { %4633 = vmatprep.mubr.msk.bf16.mxu0 %vm5057_vm2, %v6201_v14  ;;  %4637 = vmatprep.subr.bf16.mxu1 %v6201_v14  ;;  %v1747_v24 = vsel %vm657_vm4, %v1742_v23, 0 }
 0x33a   :  { %4643 = vmatprep.subr.bf16.mxu0 %v6201_v14 }
 0x33e   :  { %4628 = vmatmul.mubr.msk.bf16.vlgmr.msra.gmra.mrb[44].mxu1 %vm156_vm3, %v1438_v16 }
 0x33f   :  { %4634 = vmatmul.mubr.msk.bf16.vlgmr.msra.gmra.mrb[48].mxu0 %vm156_vm3, %v1489_v18  ;;  %4638 = vmatpush3.bf16.xpose.msra.mxu1 %v1547_v19 }
 0x340   :  { %4644 = vmatpush3.bf16.msra.mxu0 %v1699_v20  ;;  %4639 = vmatprep.mubr.msk.bf16.mxu1 %vm5057_vm2, %v6201_v14 }
 0x341   :  { %4649 = vmatprep.subr.bf16.mxu1 %v6201_v14  ;;  %4645 = vmatprep.mubr.msk.bf16.mxu0 %vm5057_vm2, %v6201_v14 }
 0x342   :  { %4655 = vmatprep.subr.bf16.mxu0 %v6201_v14 }
 0x346   :  { %4640 = vmatmul.mubr.msk.bf16.vlgmr.msra.gmra.mrb[48].mxu1 %vm156_vm3, %v1540_v13 }
 0x347   :  { %4650 = vmatpush3.bf16.msra.mxu1 %v1747_v24  ;;  %4651 = vmatprep.mubr.msk.bf16.mxu1 %vm5057_vm2, %v6201_v14 }
 0x348   :  { %4661 = vmatprep.subr.bf16.mxu1 %v6201_v14 }
 0x3af   :  { %v5433_v26 = vpop.f32.mrb[20].mxu0 }
 0x3b0   :  { %v4551_v28 = vpop.f32.mrb[21].mxu0 }
 0x3b1   :  { %v698_v31 = vpop.f32.mrb[22].mxu0 }
 0x3b2   :  { %v4552_v32 = vpop.f32.mrb[23].mxu0 }
 0x3b4   :  { %v5435_v34 = vpop.f32.mrb[20].mxu1 }
 0x3b5   :  { %v4557_v35 = vpop.f32.mrb[21].mxu1 }
 0x3b6   :  { %v746_v39 = vpop.f32.mrb[22].mxu1 }
 0x3b7   :  { %v4558_v40 = vpop.f32.mrb[23].mxu1  ;;  %v5437_v41 = vpop.f32.mrb[24].mxu0 }
 0x3b8   :  { %v4563_v42 = vpop.f32.mrb[25].mxu0 }
 0x3b9   :  { %v794_v43 = vpop.f32.mrb[26].mxu0 }
 0x3ba   :  { %v4564_v44 = vpop.f32.mrb[27].mxu0 }
 0x3bc   :  { %v5439_v46 = vpop.f32.mrb[24].mxu1 }
 0x3bd   :  { %v4569_v47 = vpop.f32.mrb[25].mxu1 }
 0x3be   :  { %v842_v48 = vpop.f32.mrb[26].mxu1 }
 0x3bf   :  { %v4570_v49 = vpop.f32.mrb[27].mxu1 }
 0x3c4   :  { %v5441_v50 = vpop.f32.mrb[28].mxu1 }
 0x3c5   :  { %v4581_v51 = vpop.f32.mrb[29].mxu1 }
 0x3c6   :  { %v938_v52 = vpop.f32.mrb[30].mxu1 }
 0x3c7   :  { %v4582_v53 = vpop.f32.mrb[31].mxu1 }
 0x3e9   :  { %v5443_v56 = vpop.f32.mrb[28].mxu0 }
 0x3ea   :  { %v4575_v54 = vpop.f32.mrb[29].mxu0 }
 0x3eb   :  { %v890_v57 = vpop.f32.mrb[30].mxu0 }
 0x3ec   :  { %v4576_v58 = vpop.f32.mrb[31].mxu0 }
 0x3f1   :  { %v5445_v59 = vpop.f32.mrb[32].mxu0 }
 0x3f2   :  { %6205 = vst [vmem:[#allocation6_spill] sm:$0xff] %v5445_v59  ;;  %v4587_v61 = vpop.f32.mrb[33].mxu0 }
 0x3f3   :  { %v986_v63 = vpop.f32.mrb[34].mxu0 }
 0x3f4   :  { %v4588_v1 = vpop.f32.mrb[35].mxu0 }
 0x3f9   :  { %v5447_v2 = vpop.f32.mrb[32].mxu1 }
 0x3fa   :  { %6206 = vst [vmem:[#allocation7_spill] sm:$0xff] %v5447_v2  ;;  %v1226_v3 = vpop.f32.mrb[36].mxu0  ;;  %v4593_v4 = vpop.f32.mrb[33].mxu1 }
 0x3fb   :  { %v5451_v5 = vsel %vm5227_vm5, %v1226_v3, -1e+30  ;;  %v4599_v7 = vpop.f32.mrb[37].mxu0  ;;  %v1034_v8 = vpop.f32.mrb[34].mxu1 }
 0x3fc   :  { %v1229_v10 = vpop.f32.mrb[38].mxu0  ;;  %v1597_v6 = vsel %vm156_vm3, %v5451_v5, -inf  ;;  %v4594_v0 = vpop.f32.mrb[35].mxu1 }
 0x3fd   :  { %1598 = vmax.xlane.f32.xlu0 %v1597_v6  ;;  %v4600_v13 = vpop.f32.mrb[39].mxu0 }
 0x401   :  { %v1277_v15 = vpop.f32.mrb[36].mxu1 }
 0x402   :  { %v5457_v16 = vsel %vm5227_vm5, %v1277_v15, -1e+30  ;;  %v1328_v17 = vpop.f32.mrb[40].mxu0  ;;  %v4605_v18 = vpop.f32.mrb[37].mxu1 }
 0x403   :  { %v5461_v19 = vsel %vm5227_vm5, %v1328_v17, -1e+30  ;;  %v4611_v20 = vpop.f32.mrb[41].mxu0  ;;  %v1280_v23 = vpop.f32.mrb[38].mxu1  ;;  %v1600_v24 = vsel %vm156_vm3, %v5457_v16, -inf }
 0x404   :  { %v1331_v28 = vpop.f32.mrb[42].mxu0  ;;  %1601 = vmax.xlane.f32.xlu1 %v1600_v24  ;;  %v4606_v31 = vpop.f32.mrb[39].mxu1  ;;  %v1603_v32 = vsel %vm156_vm3, %v5461_v19, -inf }
 0x405   :  { %1604 = vmax.xlane.f32.xlu0 %v1603_v32  ;;  %v4612_v35 = vpop.f32.mrb[43].mxu0  ;;  %v1790_v24 = vpop.permute.xlu1 %1789 }
 0x409   :  { %v1379_v39 = vpop.f32.mrb[40].mxu1  ;;  %v1838_v28 = vpop.permute.xlu1 %1837 }
 0x40a   :  { %v5469_v40 = vsel %vm5227_vm5, %v1379_v39, -1e+30  ;;  %v1430_v42 = vpop.f32.mrb[44].mxu0  ;;  %v4617_v43 = vpop.f32.mrb[41].mxu1 }
 0x40b   :  { %v5473_v44 = vsel %vm5227_vm5, %v1430_v42, -1e+30  ;;  %v4623_v47 = vpop.f32.mrb[45].mxu0  ;;  %v1382_v48 = vpop.f32.mrb[42].mxu1  ;;  %v1606_v49 = vsel %vm156_vm3, %v5469_v40, -inf }
 0x40c   :  { %v1433_v51 = vpop.f32.mrb[46].mxu0  ;;  %1607 = vmax.xlane.f32.xlu0 %v1606_v49  ;;  %v4618_v52 = vpop.f32.mrb[43].mxu1  ;;  %v1609_v53 = vsel %vm156_vm3, %v5473_v44, -inf }
 0x40d   :  { %1610 = vmax.xlane.f32.xlu1 %v1609_v53  ;;  %v4624_v54 = vpop.f32.mrb[47].mxu0  ;;  %v1934_v32 = vpop.permute.xlu1 %1933  ;;  %v1795_v52 = vsel %vm657_vm4, %v1790_v24, 0 }
 0x411   :  { %v1481_v57 = vpop.f32.mrb[44].mxu1 }
 0x412   :  { %v5481_v58 = vsel %vm5227_vm5, %v1481_v57, -1e+30  ;;  %v1532_v61 = vpop.f32.mrb[48].mxu0  ;;  %v4629_v63 = vpop.f32.mrb[45].mxu1 }
 0x413   :  { %v4635_v1 = vpop.f32.mrb[49].mxu0  ;;  %v1484_v3 = vpop.f32.mrb[46].mxu1  ;;  %v1612_v4 = vsel %vm156_vm3, %v5481_v58, -inf  ;;  %v5491_v17 = vsel %vm5227_vm5, %v1532_v61, -1e+30  ;;  %v1843_v63 = vsel %vm657_vm4, %v1838_v28, 0 }
 0x414   :  { %v1535_v7 = vpop.f32.mrb[50].mxu0  ;;  %1613 = vmax.xlane.f32.xlu0 %v1612_v4  ;;  %v4630_v8 = vpop.f32.mrb[47].mxu1  ;;  %v1615_v18 = vsel %vm156_vm3, %v5491_v17, -inf }
 0x415   :  { %v4636_v10 = vpop.f32.mrb[51].mxu0 }
 0x419   :  { %v1583_v6 = vpop.f32.mrb[48].mxu1 }
 0x41a   :  { %v4641_v0 = vpop.f32.mrb[49].mxu1  ;;  %v5497_v20 = vsel %vm5227_vm5, %v1583_v6, -1e+30  ;;  %v1939_v6 = vsel %vm657_vm4, %v1934_v32, 0 }
 0x41b   :  { %v1586_v13 = vpop.f32.mrb[50].mxu1  ;;  %v1618_v23 = vsel %vm156_vm3, %v5497_v20, -inf }
 0x41c   :  { %v4642_v15 = vpop.f32.mrb[51].mxu1 }
 0x41e   :  { %2029 = vrot.lane.b32.xlu1 %v5161_v38, %s5062_s7 }
 0x42a   :  { %1981 = vrot.lane.b32.xlu0 %v5158_v37, %s5062_s7 }
 0x442   :  { %1616 = vmax.xlane.f32.xlu1 %v1615_v18 }
 0x449   :  { %1619 = vmax.xlane.f32.xlu0 %v1618_v23 }
 0x453   :  { %2269 = vrot.lane.b32.xlu1 %v5149_v30, %s5063_s8 }
 0x457   :  { %2320 = vrot.lane.b32.xlu1 %v5138_v22, %s5063_s8 }
 0x45b   :  { %2371 = vrot.lane.b32.xlu1 %v5147_v29, %s5063_s8 }
 0x45f   :  { %2422 = vrot.lane.b32.xlu1 %v5153_v33, %s5063_s8  ;;  %2218 = vrot.lane.b32.xlu0 %v5141_v25, %s5063_s8 }
 0x463   :  { %2473 = vrot.lane.b32.xlu1 %v5156_v36, %s5063_s8  ;;  %2216 = vrot.lane.b32.xlu0 %v5141_v25, %s5064_s9 }
 0x467   :  { %2524 = vrot.lane.b32.xlu1 %v5158_v37, %s5063_s8  ;;  %2267 = vrot.lane.b32.xlu0 %v5149_v30, %s5064_s9 }
 0x46b   :  { %2575 = vrot.lane.b32.xlu1 %v5161_v38, %s5063_s8  ;;  %2318 = vrot.lane.b32.xlu0 %v5138_v22, %s5064_s9 }
 0x46f   :  { %2573 = vrot.lane.b32.xlu1 %v5161_v38, %s5064_s9  ;;  %2369 = vrot.lane.b32.xlu0 %v5147_v29, %s5064_s9 }
 0x473   :  { %2727 = vrot.lane.b32.xlu1 %v5141_v25, %s5065_s10  ;;  %2420 = vrot.lane.b32.xlu0 %v5153_v33, %s5064_s9  ;;  %v1886_v25 = vpop.permute.xlu0 %1885 }
 0x474   :  { %v1891_v1 = vsel %vm657_vm4, %v1886_v25, 0 }
 0x477   :  { %2823 = vrot.lane.b32.xlu1 %v5138_v22, %s5065_s10  ;;  %2471 = vrot.lane.b32.xlu0 %v5156_v36, %s5064_s9 }
 0x47b   :  { %2871 = vrot.lane.b32.xlu1 %v5147_v29, %s5065_s10  ;;  %2522 = vrot.lane.b32.xlu0 %v5158_v37, %s5064_s9 }
 0x47f   :  { %2967 = vrot.lane.b32.xlu1 %v5156_v36, %s5065_s10  ;;  %2775 = vrot.lane.b32.xlu0 %v5149_v30, %s5065_s10 }
 0x483   :  { %2919 = vrot.lane.b32.xlu0 %v5153_v33, %s5065_s10 }
 0x48a   :  { %v1599_v22 = vpop.xlane.xlu0 %1598 }
 0x48b   :  { %v1621_v31 = vsub.f32 %v5451_v5, %v1599_v22 }
 0x48d   :  { %v1629_v35 = vmul.f32 1.442695, %v1621_v31 }
 0x48f   :  { %4920 = vpow2.f32 %v1629_v35 }
 0x491   :  { %v1602_v29 = vpop.xlane.xlu1 %1601 }
 0x492   :  { %v1605_v39 = vpop.xlane.xlu0 %1604  ;;  %v1622_v42 = vsub.f32 %v5457_v16, %v1602_v29 }
 0x493   :  { %v1623_v36 = vsub.f32 %v5461_v19, %v1605_v39 }
 0x494   :  { %v1631_v43 = vmul.f32 1.442695, %v1622_v42 }
 0x495   :  { %v1633_v30 = vmul.f32 1.442695, %v1623_v36 }
 0x496   :  { %4922 = vpow2.f32 %v1631_v43 }
 0x497   :  { %4924 = vpow2.f32 %v1633_v30 }
 0x499   :  { %v5532_v47 = vpop.eup %4920  ;;  %v1608_v33 = vpop.xlane.xlu0 %1607 }
 0x49a   :  { %v1624_v48 = vsub.f32 %v5469_v40, %v1608_v33  ;;  %v1611_v49 = vpop.xlane.xlu1 %1610  ;;  %v1685_v5 = vpack.c.bf16 %v5532_v47, %v5532_v47 }
 0x49b   :  { %v1625_v51 = vsub.f32 %v5473_v44, %v1611_v49 }
 0x49c   :  { %v1635_v16 = vmul.f32 1.442695, %v1624_v48  ;;  %4646 = vmatmul.mubr.msk.bf16.vlgmr.msra.gmra.mrb[52].mxu0 %vm156_vm3, %v1685_v5 }
 0x49d   :  { %v1637_v19 = vmul.f32 1.442695, %v1625_v51  ;;  %4656 = vmatpush3.bf16.msra.mxu0 %v1795_v52  ;;  %4657 = vmatprep.mubr.msk.bf16.mxu0 %vm5057_vm2, %v6201_v14 }
 0x49e   :  { %4926 = vpow2.f32 %v1635_v16  ;;  %4667 = vmatprep.subr.bf16.mxu0 %v6201_v14  ;;  %v2030_v15 = vpop.permute.xlu1 %2029 }
 0x49f   :  { %4928 = vpow2.f32 %v1637_v19  ;;  %v2035_v23 = vsel %vm657_vm4, %v2030_v15, 0 }
 0x4a0   :  { %v5543_v40 = vpop.eup %4922 }
 0x4a1   :  { %v5545_v53 = vpop.eup %4924  ;;  %v1614_v54 = vpop.xlane.xlu0 %1613  ;;  %v1686_v44 = vpack.c.bf16 %v5543_v40, %v5543_v40  ;;  %v1648_v62 = vsel %vm156_vm3, %v5543_v40, 0.0  ;;  %v1645_v40 = vsel %vm156_vm3, %v5532_v47, 0.0 }
 0x4a2   :  { %v1626_v57 = vsub.f32 %v5481_v58, %v1614_v54  ;;  %v1687_v61 = vpack.c.bf16 %v5545_v53, %v5545_v53 }
 0x4a3   :  { %4652 = vmatmul.mubr.msk.bf16.vlgmr.msra.gmra.mrb[52].mxu1 %vm156_vm3, %v1686_v44 }
 0x4a4   :  { %v1639_v3 = vmul.f32 1.442695, %v1626_v57  ;;  %4658 = vmatmul.mubr.msk.bf16.vlgmr.msra.gmra.mrb[56].mxu0 %vm156_vm3, %v1687_v61  ;;  %4662 = vmatpush3.bf16.msra.mxu1 %v1843_v63 }
 0x4a5   :  { %4668 = vmatpush3.bf16.msra.mxu0 %v1891_v1  ;;  %4663 = vmatprep.mubr.msk.bf16.mxu1 %vm5057_vm2, %v6201_v14  ;;  %v1982_v7 = vpop.permute.xlu0 %1981 }
 0x4a6   :  { %4930 = vpow2.f32 %v1639_v3  ;;  %4669 = vmatprep.mubr.msk.bf16.mxu0 %vm5057_vm2, %v6201_v14  ;;  %4673 = vmatprep.subr.bf16.mxu1 %v6201_v14  ;;  %v1987_v0 = vsel %vm657_vm4, %v1982_v7, 0 }
 0x4a7   :  { %4679 = vmatprep.subr.bf16.mxu0 %v6201_v14 }
 0x4a8   :  { %v5562_v58 = vpop.eup %4926 }
 0x4a9   :  { %v5564_v4 = vpop.eup %4928  ;;  %v1688_v8 = vpack.c.bf16 %v5562_v58, %v5562_v58 }
 0x4aa   :  { %v1689_v10 = vpack.c.bf16 %v5564_v4, %v5564_v4 }
 0x4ab   :  { %4664 = vmatmul.mubr.msk.bf16.vlgmr.msra.gmra.mrb[56].mxu1 %vm156_vm3, %v1688_v8 }
 0x4ac   :  { %4670 = vmatmul.mubr.msk.bf16.vlgmr.msra.gmra.mrb[60].mxu0 %vm156_vm3, %v1689_v10  ;;  %4674 = vmatpush3.bf16.msra.mxu1 %v1939_v6 }
 0x4ad   :  { %4680 = vmatpush3.bf16.msra.mxu0 %v1987_v0  ;;  %4675 = vmatprep.mubr.msk.bf16.mxu1 %vm5057_vm2, %v6201_v14 }
 0x4ae   :  { %4685 = vmatprep.subr.bf16.mxu1 %v6201_v14  ;;  %4681 = vmatprep.mubr.msk.bf16.mxu0 %vm5057_vm2, %v6201_v14 }
 0x4af   :  { %4691 = vmatprep.subr.bf16.mxu0 %v6201_v14 }
 0x4b0   :  { %v5580_v13 = vpop.eup %4930 }
 0x4b1   :  { %v1690_v18 = vpack.c.bf16 %v5580_v13, %v5580_v13 }
 0x4b3   :  { %4676 = vmatmul.mubr.msk.bf16.vlgmr.msra.gmra.mrb[60].mxu1 %vm156_vm3, %v1690_v18 }
 0x4b4   :  { %4686 = vmatpush3.bf16.msra.mxu1 %v2035_v23  ;;  %4687 = vmatprep.mubr.msk.bf16.mxu1 %vm5057_vm2, %v6201_v14 }
 0x4b5   :  { %4697 = vmatprep.subr.bf16.mxu1 %v6201_v14 }
 0x4cf   :  { %v1617_v24 = vpop.xlane.xlu1 %1616 }
 0x4d0   :  { %v1627_v25 = vsub.f32 %v5491_v17, %v1617_v24 }
 0x4d2   :  { %v1641_v28 = vmul.f32 1.442695, %v1627_v25 }
 0x4d3   :  { %v2270_v22 = vpop.permute.xlu1 %2269 }
 0x4d4   :  { %4932 = vpow2.f32 %v1641_v28  ;;  %v2275_v52 = vsel %vm156_vm3, %v2270_v22, 0 }
 0x4d6   :  { %v1620_v31 = vpop.xlane.xlu0 %1619 }
 0x4d7   :  { %v1628_v32 = vsub.f32 %v5497_v20, %v1620_v31  ;;  %v2321_v35 = vpop.permute.xlu1 %2320 }
 0x4d8   :  { %v2326_v16 = vsel %vm156_vm3, %v2321_v35, 0 }
 0x4d9   :  { %v1643_v29 = vmul.f32 1.442695, %v1628_v32 }
 0x4da   :  { %v2219_v39 = vpop.permute.xlu0 %2218 }
 0x4db   :  { %4934 = vpow2.f32 %v1643_v29  ;;  %v2372_v42 = vpop.permute.xlu1 %2371  ;;  %v2224_v17 = vsel %vm156_vm3, %v2219_v39, 0 }
 0x4dc   :  { %v2377_v44 = vsel %vm156_vm3, %v2372_v42, 0 }
 0x4de   :  { %v5591_v36 = vpop.eup %4932  ;;  %v2217_v43 = vpop.permute.xlu0 %2216 }
 0x4df   :  { %v1691_v30 = vpack.c.bf16 %v5591_v36, %v5591_v36  ;;  %v2423_v33 = vpop.permute.xlu1 %2422 }
 0x4e0   :  { %v2428_v57 = vsel %vm156_vm3, %v2423_v33, 0 }
 0x4e1   :  { %4682 = vmatmul.mubr.msk.bf16.vlgmr.msra.gmra.mrb[64].mxu0 %vm156_vm3, %v1691_v30 }
 0x4e2   :  { %4692 = vmatpush3.bf16.xpose.msra.mxu0 %v2224_v17  ;;  %v2268_v48 = vpop.permute.xlu0 %2267  ;;  %4693 = vmatprep.mubr.msk.bf16.mxu0 %vm5057_vm2, %v6201_v14 }
 0x4e3   :  { %4703 = vmatprep.subr.bf16.mxu0 %v6201_v14  ;;  %v2474_v49 = vpop.permute.xlu1 %2473 }
 0x4e4   :  { %v2479_v1 = vsel %vm156_vm3, %v2474_v49, 0 }
 0x4e5   :  { %v5600_v20 = vpop.eup %4934 }
 0x4e6   :  { %v1692_v5 = vpack.c.bf16 %v5600_v20, %v5600_v20  ;;  %v2319_v51 = vpop.permute.xlu0 %2318 }
 0x4e7   :  { %v2525_v19 = vpop.permute.xlu1 %2524 }
 0x4e8   :  { %4688 = vmatmul.mubr.msk.bf16.vlgmr.msra.gmra.mrb[64].mxu1 %vm156_vm3, %v1692_v5  ;;  %v2530_v7 = vsel %vm156_vm3, %v2525_v19, 0 }
 0x4e9   :  { %4694 = vmatmul.mubr.msk.bf16.vlgmr.msra.gmra.mrb[68].mxu0 %vm156_vm3, %v2217_v43  ;;  %4698 = vmatpush3.bf16.xpose.msra.mxu1 %v2275_v52 }
 0x4ea   :  { %4704 = vmatpush3.bf16.xpose.msra.mxu0 %v2326_v16  ;;  %4699 = vmatprep.mubr.msk.bf16.mxu1 %vm5057_vm2, %v6201_v14  ;;  %v2370_v54 = vpop.permute.xlu0 %2369 }
 0x4eb   :  { %4705 = vmatprep.mubr.msk.bf16.mxu0 %vm5057_vm2, %v6201_v14  ;;  %4709 = vmatprep.subr.bf16.mxu1 %v6201_v14  ;;  %v2576_v61 = vpop.permute.xlu1 %2575 }
 0x4ec   :  { %4715 = vmatprep.subr.bf16.mxu0 %v6201_v14  ;;  %v2581_v0 = vsel %vm156_vm3, %v2576_v61, 0 }
 0x4ee   :  { %v2421_v63 = vpop.permute.xlu0 %2420 }
 0x4ef   :  { %v2574_v3 = vpop.permute.xlu1 %2573 }
 0x4f0   :  { %4700 = vmatmul.mubr.msk.bf16.vlgmr.msra.gmra.mrb[68].mxu1 %vm156_vm3, %v2268_v48 }
 0x4f1   :  { %4706 = vmatmul.mubr.msk.bf16.vlgmr.msra.gmra.mrb[72].mxu0 %vm156_vm3, %v2319_v51  ;;  %4710 = vmatpush3.bf16.xpose.msra.mxu1 %v2377_v44 }
 0x4f2   :  { %4716 = vmatpush3.bf16.xpose.msra.mxu0 %v2428_v57  ;;  %4711 = vmatprep.mubr.msk.bf16.mxu1 %vm5057_vm2, %v6201_v14  ;;  %v2472_v8 = vpop.permute.xlu0 %2471 }
 0x4f3   :  { %4717 = vmatprep.mubr.msk.bf16.mxu0 %vm5057_vm2, %v6201_v14  ;;  %4721 = vmatprep.subr.bf16.mxu1 %v6201_v14  ;;  %v2728_v10 = vpop.permute.xlu1 %2727 }
 0x4f4   :  { %4727 = vmatprep.subr.bf16.mxu0 %v6201_v14  ;;  %v2733_v15 = vsel %vm657_vm4, %v2728_v10, 0 }
 0x4f6   :  { %v2523_v6 = vpop.permute.xlu0 %2522 }
 0x4f8   :  { %4712 = vmatmul.mubr.msk.bf16.vlgmr.msra.gmra.mrb[72].mxu1 %vm156_vm3, %v2370_v54 }
 0x4f9   :  { %4718 = vmatmul.mubr.msk.bf16.vlgmr.msra.gmra.mrb[76].mxu0 %vm156_vm3, %v2421_v63  ;;  %4722 = vmatpush3.bf16.xpose.msra.mxu1 %v2479_v1 }
 0x4fa   :  { %4728 = vmatpush3.bf16.xpose.msra.mxu0 %v2530_v7  ;;  %4723 = vmatprep.mubr.msk.bf16.mxu1 %vm5057_vm2, %v6201_v14  ;;  %v2776_v18 = vpop.permute.xlu0 %2775 }
 0x4fb   :  { %4729 = vmatprep.mubr.msk.bf16.mxu0 %vm5057_vm2, %v6201_v14  ;;  %4733 = vmatprep.subr.bf16.mxu1 %v6201_v14  ;;  %v2781_v23 = vsel %vm657_vm4, %v2776_v18, 0 }
 0x4fc   :  { %4739 = vmatprep.subr.bf16.mxu0 %v6201_v14 }
 0x500   :  { %4724 = vmatmul.mubr.msk.bf16.vlgmr.msra.gmra.mrb[76].mxu1 %vm156_vm3, %v2472_v8 }
 0x501   :  { %4730 = vmatmul.mubr.msk.bf16.vlgmr.msra.gmra.mrb[80].mxu0 %vm156_vm3, %v2523_v6  ;;  %4734 = vmatpush3.bf16.xpose.msra.mxu1 %v2581_v0 }
 0x502   :  { %4740 = vmatpush3.bf16.msra.mxu0 %v2733_v15  ;;  %4735 = vmatprep.mubr.msk.bf16.mxu1 %vm5057_vm2, %v6201_v14 }
 0x503   :  { %4745 = vmatprep.subr.bf16.mxu1 %v6201_v14  ;;  %4741 = vmatprep.mubr.msk.bf16.mxu0 %vm5057_vm2, %v6201_v14 }
 0x504   :  { %4751 = vmatprep.subr.bf16.mxu0 %v6201_v14 }
 0x508   :  { %4736 = vmatmul.mubr.msk.bf16.vlgmr.msra.gmra.mrb[80].mxu1 %vm156_vm3, %v2574_v3 }
 0x509   :  { %4746 = vmatpush3.bf16.msra.mxu1 %v2781_v23  ;;  %4747 = vmatprep.mubr.msk.bf16.mxu1 %vm5057_vm2, %v6201_v14 }
 0x50a   :  { %4757 = vmatprep.subr.bf16.mxu1 %v6201_v14 }
 0x56f   :  { %v5649_v24 = vpop.f32.mrb[52].mxu0 }
 0x570   :  { %v4647_v25 = vpop.f32.mrb[53].mxu0 }
 0x571   :  { %v1738_v28 = vpop.f32.mrb[54].mxu0 }
 0x572   :  { %v4648_v22 = vpop.f32.mrb[55].mxu0 }
 0x576   :  { %v5651_v31 = vpop.f32.mrb[52].mxu1 }
 0x577   :  { %v5653_v32 = vpop.f32.mrb[56].mxu0  ;;  %v4653_v35 = vpop.f32.mrb[53].mxu1 }
 0x578   :  { %6207 = vst [vmem:[#allocation8_spill] sm:$0xff] %v5653_v32  ;;  %v4659_v29 = vpop.f32.mrb[57].mxu0  ;;  %v1786_v39 = vpop.f32.mrb[54].mxu1 }
 0x579   :  { %v1834_v42 = vpop.f32.mrb[58].mxu0  ;;  %v4654_v43 = vpop.f32.mrb[55].mxu1 }
 0x57a   :  { %v4660_v30 = vpop.f32.mrb[59].mxu0 }
 0x57e   :  { %v5655_v33 = vpop.f32.mrb[56].mxu1 }
 0x57f   :  { %6208 = vst [vmem:[#allocation9_spill] sm:$0xff] %v5655_v33  ;;  %v5657_v17 = vpop.f32.mrb[60].mxu0  ;;  %v4665_v48 = vpop.f32.mrb[57].mxu1 }
 0x580   :  { %6209 = vst [vmem:[#allocation10_spill] sm:$0xff] %v5657_v17  ;;  %v4671_v49 = vpop.f32.mrb[61].mxu0  ;;  %v1882_v5 = vpop.f32.mrb[58].mxu1 }
 0x581   :  { %v1930_v51 = vpop.f32.mrb[62].mxu0  ;;  %v4666_v52 = vpop.f32.mrb[59].mxu1 }
 0x582   :  { %v4672_v16 = vpop.f32.mrb[63].mxu0 }
 0x586   :  { %v5659_v19 = vpop.f32.mrb[60].mxu1 }
 0x587   :  { %6210 = vst [vmem:[#allocation11_spill] sm:$0xff] %v5659_v19  ;;  %v4677_v54 = vpop.f32.mrb[61].mxu1 }
 0x588   :  { %v1978_v44 = vpop.f32.mrb[62].mxu1 }
 0x589   :  { %v4678_v57 = vpop.f32.mrb[63].mxu1 }
 0x5b4   :  { %v5661_v61 = vpop.f32.mrb[64].mxu0 }
 0x5b5   :  { %6211 = vst [vmem:[#allocation12_spill] sm:$0xff] %v5661_v61  ;;  %v4683_v63 = vpop.f32.mrb[65].mxu0 }
 0x5b6   :  { %v2026_v1 = vpop.f32.mrb[66].mxu0 }
 0x5b7   :  { %v4684_v3 = vpop.f32.mrb[67].mxu0 }
 0x5bb   :  { %v5663_v7 = vpop.f32.mrb[64].mxu1 }
 0x5bc   :  { %6212 = vst [vmem:[#allocation13_spill] sm:$0xff] %v5663_v7  ;;  %v2260_v8 = vpop.f32.mrb[68].mxu0  ;;  %v4689_v10 = vpop.f32.mrb[65].mxu1 }
 0x5bd   :  { %v5667_v6 = vsel %vm5227_vm5, %v2260_v8, -1e+30  ;;  %v4695_v0 = vpop.f32.mrb[69].mxu0  ;;  %v2074_v15 = vpop.f32.mrb[66].mxu1 }
 0x5be   :  { %v2263_v18 = vpop.f32.mrb[70].mxu0  ;;  %v4690_v23 = vpop.f32.mrb[67].mxu1  ;;  %v2631_v25 = vsel %vm156_vm3, %v5667_v6, -inf }
 0x5bf   :  { %2632 = vmax.xlane.f32.xlu0 %v2631_v25  ;;  %v4696_v28 = vpop.f32.mrb[71].mxu0 }
 0x5c3   :  { %v2311_v22 = vpop.f32.mrb[68].mxu1 }
 0x5c4   :  { %v5673_v35 = vsel %vm5227_vm5, %v2311_v22, -1e+30  ;;  %v2362_v29 = vpop.f32.mrb[72].mxu0  ;;  %v4701_v39 = vpop.f32.mrb[69].mxu1 }
 0x5c5   :  { %v5677_v42 = vsel %vm5227_vm5, %v2362_v29, -1e+30  ;;  %v4707_v43 = vpop.f32.mrb[73].mxu0  ;;  %v2314_v30 = vpop.f32.mrb[70].mxu1  ;;  %v2634_v48 = vsel %vm156_vm3, %v5673_v35, -inf }
 0x5c6   :  { %v2365_v49 = vpop.f32.mrb[74].mxu0  ;;  %2635 = vmax.xlane.f32.xlu1 %v2634_v48  ;;  %v4702_v5 = vpop.f32.mrb[71].mxu1  ;;  %v2637_v51 = vsel %vm156_vm3, %v5677_v42, -inf }
 0x5c7   :  { %2638 = vmax.xlane.f32.xlu0 %v2637_v51  ;;  %v4708_v52 = vpop.f32.mrb[75].mxu0 }
 0x5cb   :  { %v2413_v16 = vpop.f32.mrb[72].mxu1 }
 0x5cc   :  { %v5685_v54 = vsel %vm5227_vm5, %v2413_v16, -1e+30  ;;  %v2464_v44 = vpop.f32.mrb[76].mxu0  ;;  %v4713_v57 = vpop.f32.mrb[73].mxu1 }
 0x5cd   :  { %v5689_v63 = vsel %vm5227_vm5, %v2464_v44, -1e+30  ;;  %v4719_v1 = vpop.f32.mrb[77].mxu0  ;;  %v2416_v3 = vpop.f32.mrb[74].mxu1  ;;  %v2640_v8 = vsel %vm156_vm3, %v5685_v54, -inf }
 0x5ce   :  { %v2467_v10 = vpop.f32.mrb[78].mxu0  ;;  %2641 = vmax.xlane.f32.xlu0 %v2640_v8  ;;  %v4714_v0 = vpop.f32.mrb[75].mxu1  ;;  %v2643_v15 = vsel %vm156_vm3, %v5689_v63, -inf }
 0x5cf   :  { %2644 = vmax.xlane.f32.xlu1 %v2643_v15  ;;  %v4720_v18 = vpop.f32.mrb[79].mxu0  ;;  %v3235_v10 = vld [vmem:[#allocation2 + $0x10] sm:$0xff]  ;;  %v3236_v0 = vld [vmem:[#allocation2 + $0x18] sm:$0xff] }
 0x5d0   :  { %v3244_v15 = vpack.c.bf16 %v3236_v0, %v3236_v0  ;;  %v3237_v18 = vld [vmem:[#allocation2 + $0x20] sm:$0xff] }
 0x5d3   :  { %v2515_v23 = vpop.f32.mrb[76].mxu1 }
 0x5d4   :  { %v5697_v25 = vsel %vm5227_vm5, %v2515_v23, -1e+30  ;;  %v2566_v28 = vpop.f32.mrb[80].mxu0  ;;  %v4725_v22 = vpop.f32.mrb[77].mxu1  ;;  %v3233_v23 = vld [vmem:[#allocation2] sm:$0xff] }
 0x5d5   :  { %v4731_v29 = vpop.f32.mrb[81].mxu0  ;;  %v2518_v39 = vpop.f32.mrb[78].mxu1  ;;  %v2646_v43 = vsel %vm156_vm3, %v5697_v25, -inf  ;;  %v5707_v44 = vsel %vm5227_vm5, %v2566_v28, -1e+30  ;;  %v5717_v28 = vpack.c.bf16 %v3237_v18, %v3237_v18  ;;  %v3241_v22 = vpack.c.bf16 %v3233_v23, %v3233_v23 }
 0x5d6   :  { %v2569_v30 = vpop.f32.mrb[82].mxu0  ;;  %2647 = vmax.xlane.f32.xlu0 %v2646_v43  ;;  %v4726_v48 = vpop.f32.mrb[79].mxu1  ;;  %v2649_v57 = vsel %vm156_vm3, %v5707_v44, -inf  ;;  %v3238_v29 = vld [vmem:[#allocation2 + $0x28] sm:$0xff]  ;;  %v3239_v43 = vld [vmem:[#allocation2 + $0x30] sm:$0xff] }
 0x5d7   :  { %v4732_v49 = vpop.f32.mrb[83].mxu0  ;;  %v5720_v39 = vpack.c.bf16 %v3238_v29, %v3238_v29  ;;  %v5723_v30 = vpack.c.bf16 %v3239_v43, %v3239_v43  ;;  %v3240_v48 = vld [vmem:[#allocation2 + $0x38] sm:$0xff] }
 0x5d8   :  { %v5726_v49 = vpack.c.bf16 %v3240_v48, %v3240_v48 }
 0x5db   :  { %v2617_v5 = vpop.f32.mrb[80].mxu1 }
 0x5dc   :  { %v4737_v51 = vpop.f32.mrb[81].mxu1  ;;  %v5713_v1 = vsel %vm5227_vm5, %v2617_v5, -1e+30  ;;  %v2824_v5 = vpop.permute.xlu1 %2823 }
 0x5dd   :  { %v2620_v52 = vpop.f32.mrb[82].mxu1  ;;  %v2652_v3 = vsel %vm156_vm3, %v5713_v1, -inf  ;;  %v2920_v51 = vpop.permute.xlu0 %2919 }
 0x5de   :  { %v4738_v16 = vpop.f32.mrb[83].mxu1 }
 0x5e0   :  { %3063 = vrot.lane.b32.xlu1 %v5161_v38, %s5065_s10  ;;  %v3234_v38 = vld [vmem:[#allocation2 + $0x8] sm:$0xff]  ;;  %v2872_v52 = vpop.permute.xlu1 %2871 }
 0x5e1   :  { %v3242_v8 = vpack.c.bf16 %v3234_v38, %v3234_v38 }
 0x5ec   :  { %3015 = vrot.lane.b32.xlu0 %v5158_v37, %s5065_s10  ;;  %v3243_v37 = vpack.c.bf16 %v3235_v10, %v3235_v10 }
 0x604   :  { %2650 = vmax.xlane.f32.xlu1 %v2649_v57 }
 0x60b   :  { %2653 = vmax.xlane.f32.xlu0 %v2652_v3  ;;  %v2968_v3 = vpop.permute.xlu1 %2967 }
 0x615   :  { %3303 = vrot.lane.b32.xlu1 %v3242_v8, %s5066_s11 }
 0x619   :  { %3354 = vrot.lane.b32.xlu1 %v3243_v37, %s5066_s11 }
 0x61d   :  { %3405 = vrot.lane.b32.xlu1 %v3244_v15, %s5066_s11 }
 0x621   :  { %3456 = vrot.lane.b32.xlu1 %v5717_v28, %s5066_s11  ;;  %3252 = vrot.lane.b32.xlu0 %v3241_v22, %s5066_s11 }
 0x625   :  { %3507 = vrot.lane.b32.xlu1 %v5720_v39, %s5066_s11  ;;  %3250 = vrot.lane.b32.xlu0 %v3241_v22, %s5067_s12 }
 0x629   :  { %3558 = vrot.lane.b32.xlu1 %v5723_v30, %s5066_s11  ;;  %3301 = vrot.lane.b32.xlu0 %v3242_v8, %s5067_s12 }
 0x62d   :  { %3609 = vrot.lane.b32.xlu1 %v5726_v49, %s5066_s11  ;;  %3352 = vrot.lane.b32.xlu0 %v3243_v37, %s5067_s12 }
 0x631   :  { %3607 = vrot.lane.b32.xlu1 %v5726_v49, %s5067_s12  ;;  %3403 = vrot.lane.b32.xlu0 %v3244_v15, %s5067_s12 }
 0x635   :  { %3761 = vrot.lane.b32.xlu1 %v3241_v22, %s5068_s13  ;;  %3454 = vrot.lane.b32.xlu0 %v5717_v28, %s5067_s12 }
 0x639   :  { %3857 = vrot.lane.b32.xlu1 %v3243_v37, %s5068_s13  ;;  %3505 = vrot.lane.b32.xlu0 %v5720_v39, %s5067_s12 }
 0x63d   :  { %3905 = vrot.lane.b32.xlu1 %v3244_v15, %s5068_s13  ;;  %3556 = vrot.lane.b32.xlu0 %v5723_v30, %s5067_s12 }
 0x641   :  { %3809 = vrot.lane.b32.xlu0 %v3242_v8, %s5068_s13 }
 0x64c   :  { %v2633_v16 = vpop.xlane.xlu0 %2632 }
 0x64d   :  { %v2655_v57 = vsub.f32 %v5667_v6, %v2633_v16  ;;  %v2829_v16 = vsel %vm657_vm4, %v2824_v5, 0 }
 0x64f   :  { %v2663_v38 = vmul.f32 1.442695, %v2655_v57 }
 0x651   :  { %4936 = vpow2.f32 %v2663_v38 }
 0x653   :  { %v2636_v10 = vpop.xlane.xlu1 %2635 }
 0x654   :  { %v2639_v0 = vpop.xlane.xlu0 %2638  ;;  %v2656_v37 = vsub.f32 %v5673_v35, %v2636_v10 }
 0x655   :  { %v2657_v18 = vsub.f32 %v5677_v42, %v2639_v0  ;;  %v2877_v0 = vsel %vm657_vm4, %v2872_v52, 0 }
 0x656   :  { %v2665_v15 = vmul.f32 1.442695, %v2656_v37  ;;  %v2925_v37 = vsel %vm657_vm4, %v2920_v51, 0 }
 0x657   :  { %v2667_v23 = vmul.f32 1.442695, %v2657_v18 }
 0x658   :  { %4938 = vpow2.f32 %v2665_v15 }
 0x659   :  { %4940 = vpow2.f32 %v2667_v23 }
 0x65b   :  { %v5740_v8 = vpop.eup %4936  ;;  %v2642_v22 = vpop.xlane.xlu0 %2641 }
 0x65c   :  { %v2658_v29 = vsub.f32 %v5685_v54, %v2642_v22  ;;  %v2645_v43 = vpop.xlane.xlu1 %2644  ;;  %v2719_v6 = vpack.c.bf16 %v5740_v8, %v5740_v8  ;;  %v2973_v22 = vsel %vm657_vm4, %v2968_v3, 0 }
 0x65d   :  { %v2659_v48 = vsub.f32 %v5689_v63, %v2645_v43 }
 0x65e   :  { %v2669_v35 = vmul.f32 1.442695, %v2658_v29  ;;  %4742 = vmatmul.mubr.msk.bf16.vlgmr.msra.gmra.mrb[84].mxu0 %vm156_vm3, %v2719_v6 }
 0x65f   :  { %v2671_v42 = vmul.f32 1.442695, %v2659_v48  ;;  %4752 = vmatpush3.bf16.msra.mxu0 %v2829_v16  ;;  %4753 = vmatprep.mubr.msk.bf16.mxu0 %vm5057_vm2, %v6201_v14 }
 0x660   :  { %4942 = vpow2.f32 %v2669_v35  ;;  %4763 = vmatprep.subr.bf16.mxu0 %v6201_v14  ;;  %v3064_v3 = vpop.permute.xlu1 %3063 }
 0x661   :  { %4944 = vpow2.f32 %v2671_v42  ;;  %v3069_v48 = vsel %vm657_vm4, %v3064_v3, 0 }
 0x662   :  { %v5751_v54 = vpop.eup %4938 }
 0x663   :  { %v5753_v57 = vpop.eup %4940  ;;  %v2648_v38 = vpop.xlane.xlu0 %2647  ;;  %v2720_v63 = vpack.c.bf16 %v5751_v54, %v5751_v54 }
 0x664   :  { %v2660_v5 = vsub.f32 %v5697_v25, %v2648_v38  ;;  %v2721_v10 = vpack.c.bf16 %v5753_v57, %v5753_v57 }
 0x665   :  { %4748 = vmatmul.mubr.msk.bf16.vlgmr.msra.gmra.mrb[84].mxu1 %vm156_vm3, %v2720_v63 }
 0x666   :  { %v2673_v18 = vmul.f32 1.442695, %v2660_v5  ;;  %4754 = vmatmul.mubr.msk.bf16.vlgmr.msra.gmra.mrb[88].mxu0 %vm156_vm3, %v2721_v10  ;;  %4758 = vmatpush3.bf16.msra.mxu1 %v2877_v0 }
 0x667   :  { %4764 = vmatpush3.bf16.msra.mxu0 %v2925_v37  ;;  %4759 = vmatprep.mubr.msk.bf16.mxu1 %vm5057_vm2, %v6201_v14  ;;  %v3016_v51 = vpop.permute.xlu0 %3015 }
 0x668   :  { %4946 = vpow2.f32 %v2673_v18  ;;  %4765 = vmatprep.mubr.msk.bf16.mxu0 %vm5057_vm2, %v6201_v14  ;;  %4769 = vmatprep.subr.bf16.mxu1 %v6201_v14  ;;  %v3021_v29 = vsel %vm657_vm4, %v3016_v51, 0 }
 0x669   :  { %4775 = vmatprep.subr.bf16.mxu0 %v6201_v14 }
 0x66a   :  { %v5770_v25 = vpop.eup %4942 }
 0x66b   :  { %v5772_v52 = vpop.eup %4944  ;;  %v2722_v15 = vpack.c.bf16 %v5770_v25, %v5770_v25 }
 0x66c   :  { %v2723_v23 = vpack.c.bf16 %v5772_v52, %v5772_v52 }
 0x66d   :  { %4760 = vmatmul.mubr.msk.bf16.vlgmr.msra.gmra.mrb[88].mxu1 %vm156_vm3, %v2722_v15 }
 0x66e   :  { %4766 = vmatmul.mubr.msk.bf16.vlgmr.msra.gmra.mrb[92].mxu0 %vm156_vm3, %v2723_v23  ;;  %4770 = vmatpush3.bf16.msra.mxu1 %v2973_v22 }
 0x66f   :  { %4776 = vmatpush3.bf16.msra.mxu0 %v3021_v29  ;;  %4771 = vmatprep.mubr.msk.bf16.mxu1 %vm5057_vm2, %v6201_v14 }
 0x670   :  { %4781 = vmatprep.subr.bf16.mxu1 %v6201_v14  ;;  %4777 = vmatprep.mubr.msk.bf16.mxu0 %vm5057_vm2, %v6201_v14 }
 0x671   :  { %4787 = vmatprep.subr.bf16.mxu0 %v6201_v14 }
 0x672   :  { %v5788_v43 = vpop.eup %4946 }
 0x673   :  { %v2724_v6 = vpack.c.bf16 %v5788_v43, %v5788_v43 }
 0x675   :  { %4772 = vmatmul.mubr.msk.bf16.vlgmr.msra.gmra.mrb[92].mxu1 %vm156_vm3, %v2724_v6 }
 0x676   :  { %4782 = vmatpush3.bf16.msra.mxu1 %v3069_v48  ;;  %4783 = vmatprep.mubr.msk.bf16.mxu1 %vm5057_vm2, %v6201_v14 }
 0x677   :  { %4793 = vmatprep.subr.bf16.mxu1 %v6201_v14 }
 0x691   :  { %v2651_v16 = vpop.xlane.xlu1 %2650 }
 0x692   :  { %v2661_v35 = vsub.f32 %v5707_v44, %v2651_v16 }
 0x694   :  { %v2675_v42 = vmul.f32 1.442695, %v2661_v35 }
 0x695   :  { %v3304_v38 = vpop.permute.xlu1 %3303 }
 0x696   :  { %4948 = vpow2.f32 %v2675_v42  ;;  %v3309_v16 = vsel %vm156_vm3, %v3304_v38, 0 }
 0x698   :  { %v2654_v63 = vpop.xlane.xlu0 %2653 }
 0x699   :  { %v2662_v5 = vsub.f32 %v5713_v1, %v2654_v63  ;;  %v3355_v10 = vpop.permute.xlu1 %3354 }
 0x69a   :  { %v3360_v35 = vsel %vm156_vm3, %v3355_v10, 0 }
 0x69b   :  { %v2677_v0 = vmul.f32 1.442695, %v2662_v5 }
 0x69c   :  { %v3253_v37 = vpop.permute.xlu0 %3252 }
 0x69d   :  { %4950 = vpow2.f32 %v2677_v0  ;;  %v3406_v18 = vpop.permute.xlu1 %3405  ;;  %v3258_v44 = vsel %vm156_vm3, %v3253_v37, 0 }
 0x69e   :  { %v3411_v63 = vsel %vm156_vm3, %v3406_v18, 0 }
 0x6a0   :  { %v5799_v51 = vpop.eup %4948  ;;  %v3251_v15 = vpop.permute.xlu0 %3250 }
 0x6a1   :  { %v2725_v23 = vpack.c.bf16 %v5799_v51, %v5799_v51  ;;  %v3457_v22 = vpop.permute.xlu1 %3456 }
 0x6a2   :  { %v3462_v5 = vsel %vm156_vm3, %v3457_v22, 0 }
 0x6a3   :  { %4778 = vmatmul.mubr.msk.bf16.vlgmr.msra.gmra.mrb[96].mxu0 %vm156_vm3, %v2725_v23 }
 0x6a4   :  { %4788 = vmatpush3.bf16.xpose.msra.mxu0 %v3258_v44  ;;  %v3302_v29 = vpop.permute.xlu0 %3301  ;;  %4789 = vmatprep.mubr.msk.bf16.mxu0 %vm5057_vm2, %v6201_v14 }
 0x6a5   :  { %4799 = vmatprep.subr.bf16.mxu0 %v6201_v14  ;;  %v3508_v3 = vpop.permute.xlu1 %3507 }
 0x6a6   :  { %v3513_v37 = vsel %vm156_vm3, %v3508_v3, 0 }
 0x6a7   :  { %v5808_v1 = vpop.eup %4950 }
 0x6a8   :  { %v2726_v6 = vpack.c.bf16 %v5808_v1, %v5808_v1  ;;  %v3353_v48 = vpop.permute.xlu0 %3352 }
 0x6a9   :  { %v3559_v42 = vpop.permute.xlu1 %3558 }
 0x6aa   :  { %4784 = vmatmul.mubr.msk.bf16.vlgmr.msra.gmra.mrb[96].mxu1 %vm156_vm3, %v2726_v6 }
 0x6ab   :  { %4790 = vmatmul.mubr.msk.bf16.vlgmr.msra.gmra.mrb[100].mxu0 %vm156_vm3, %v3251_v15  ;;  %4794 = vmatpush3.bf16.xpose.msra.mxu1 %v3309_v16  ;;  %v3564_v15 = vsel %vm156_vm3, %v3559_v42, 0 }
 0x6ac   :  { %4800 = vmatpush3.bf16.xpose.msra.mxu0 %v3360_v35  ;;  %4795 = vmatprep.mubr.msk.bf16.mxu1 %vm5057_vm2, %v6201_v14  ;;  %v3404_v38 = vpop.permute.xlu0 %3403 }
 0x6ad   :  { %4801 = vmatprep.mubr.msk.bf16.mxu0 %vm5057_vm2, %v6201_v14  ;;  %4805 = vmatprep.subr.bf16.mxu1 %v6201_v14  ;;  %v3610_v10 = vpop.permute.xlu1 %3609 }
 0x6ae   :  { %4811 = vmatprep.subr.bf16.mxu0 %v6201_v14 }
 0x6b0   :  { %v3455_v0 = vpop.permute.xlu0 %3454 }
 0x6b1   :  { %v3608_v18 = vpop.permute.xlu1 %3607 }
 0x6b2   :  { %4796 = vmatmul.mubr.msk.bf16.vlgmr.msra.gmra.mrb[100].mxu1 %vm156_vm3, %v3302_v29  ;;  %v3615_v29 = vsel %vm156_vm3, %v3610_v10, 0 }
 0x6b3   :  { %4802 = vmatmul.mubr.msk.bf16.vlgmr.msra.gmra.mrb[104].mxu0 %vm156_vm3, %v3353_v48  ;;  %4806 = vmatpush3.bf16.xpose.msra.mxu1 %v3411_v63 }
 0x6b4   :  { %4812 = vmatpush3.bf16.xpose.msra.mxu0 %v3462_v5  ;;  %4807 = vmatprep.mubr.msk.bf16.mxu1 %vm5057_vm2, %v6201_v14  ;;  %v3506_v23 = vpop.permute.xlu0 %3505 }
 0x6b5   :  { %4813 = vmatprep.mubr.msk.bf16.mxu0 %vm5057_vm2, %v6201_v14  ;;  %4817 = vmatprep.subr.bf16.mxu1 %v6201_v14  ;;  %v3762_v22 = vpop.permute.xlu1 %3761 }
 0x6b6   :  { %4823 = vmatprep.subr.bf16.mxu0 %v6201_v14  ;;  %v3767_v3 = vsel %vm657_vm4, %v3762_v22, 0 }
 0x6b8   :  { %v3557_v44 = vpop.permute.xlu0 %3556 }
 0x6ba   :  { %4808 = vmatmul.mubr.msk.bf16.vlgmr.msra.gmra.mrb[104].mxu1 %vm156_vm3, %v3404_v38 }
 0x6bb   :  { %4814 = vmatmul.mubr.msk.bf16.vlgmr.msra.gmra.mrb[108].mxu0 %vm156_vm3, %v3455_v0  ;;  %4818 = vmatpush3.bf16.xpose.msra.mxu1 %v3513_v37 }
 0x6bc   :  { %4824 = vmatpush3.bf16.xpose.msra.mxu0 %v3564_v15  ;;  %4819 = vmatprep.mubr.msk.bf16.mxu1 %vm5057_vm2, %v6201_v14  ;;  %v3810_v6 = vpop.permute.xlu0 %3809 }
 0x6bd   :  { %4825 = vmatprep.mubr.msk.bf16.mxu0 %vm5057_vm2, %v6201_v14  ;;  %4829 = vmatprep.subr.bf16.mxu1 %v6201_v14  ;;  %v3815_v48 = vsel %vm657_vm4, %v3810_v6, 0 }
 0x6be   :  { %4835 = vmatprep.subr.bf16.mxu0 %v6201_v14 }
 0x6c2   :  { %4820 = vmatmul.mubr.msk.bf16.vlgmr.msra.gmra.mrb[108].mxu1 %vm156_vm3, %v3506_v23 }
 0x6c3   :  { %4826 = vmatmul.mubr.msk.bf16.vlgmr.msra.gmra.mrb[112].mxu0 %vm156_vm3, %v3557_v44  ;;  %4830 = vmatpush3.bf16.xpose.msra.mxu1 %v3615_v29 }
 0x6c4   :  { %4836 = vmatpush3.bf16.msra.mxu0 %v3767_v3  ;;  %4831 = vmatprep.mubr.msk.bf16.mxu1 %vm5057_vm2, %v6201_v14 }
 0x6c5   :  { %4841 = vmatprep.subr.bf16.mxu1 %v6201_v14  ;;  %4837 = vmatprep.mubr.msk.bf16.mxu0 %vm5057_vm2, %v6201_v14 }
 0x6c6   :  { %4847 = vmatprep.subr.bf16.mxu0 %v6201_v14 }
 0x6ca   :  { %4832 = vmatmul.mubr.msk.bf16.vlgmr.msra.gmra.mrb[112].mxu1 %vm156_vm3, %v3608_v18 }
 0x6cb   :  { %4842 = vmatpush3.bf16.msra.mxu1 %v3815_v48  ;;  %4843 = vmatprep.mubr.msk.bf16.mxu1 %vm5057_vm2, %v6201_v14 }
 0x6cc   :  { %4853 = vmatprep.subr.bf16.mxu1 %v6201_v14 }
 0x731   :  { %v5857_v16 = vpop.f32.mrb[84].mxu0 }
 0x732   :  { %v4743_v35 = vpop.f32.mrb[85].mxu0 }
 0x733   :  { %v2772_v42 = vpop.f32.mrb[86].mxu0 }
 0x734   :  { %v4744_v38 = vpop.f32.mrb[87].mxu0 }
 0x738   :  { %v5859_v63 = vpop.f32.mrb[84].mxu1 }
 0x739   :  { %v5861_v5 = vpop.f32.mrb[88].mxu0  ;;  %v4749_v10 = vpop.f32.mrb[85].mxu1 }
 0x73a   :  { %v4755_v0 = vpop.f32.mrb[89].mxu0  ;;  %v2820_v37 = vpop.f32.mrb[86].mxu1 }
 0x73b   :  { %v2868_v15 = vpop.f32.mrb[90].mxu0  ;;  %v4750_v18 = vpop.f32.mrb[87].mxu1 }
 0x73c   :  { %v4756_v23 = vpop.f32.mrb[91].mxu0 }
 0x740   :  { %v5863_v22 = vpop.f32.mrb[88].mxu1 }
 0x741   :  { %v5865_v44 = vpop.f32.mrb[92].mxu0  ;;  %v4761_v29 = vpop.f32.mrb[89].mxu1 }
 0x742   :  { %v4767_v3 = vpop.f32.mrb[93].mxu0  ;;  %v2916_v6 = vpop.f32.mrb[90].mxu1 }
 0x743   :  { %v2964_v48 = vpop.f32.mrb[94].mxu0  ;;  %v4762_v35 = vpop.f32.mrb[91].mxu1 }
 0x744   :  { %v4768_v42 = vpop.f32.mrb[95].mxu0 }
 0x748   :  { %v5867_v38 = vpop.f32.mrb[92].mxu1 }
 0x749   :  { %6213 = vst [vmem:[#allocation14_spill] sm:$0xff] %v5867_v38  ;;  %v4773_v14 = vpop.f32.mrb[93].mxu1 }
 0x74a   :  { %v3012_v7 = vpop.f32.mrb[94].mxu1 }
 0x74b   :  { %v4774_v10 = vpop.f32.mrb[95].mxu1 }
 0x776   :  { %v5869_v0 = vpop.f32.mrb[96].mxu0 }
 0x777   :  { %6214 = vst [vmem:[#allocation15_spill] sm:$0xff] %v5869_v0  ;;  %v4779_v37 = vpop.f32.mrb[97].mxu0 }
 0x778   :  { %v3060_v15 = vpop.f32.mrb[98].mxu0 }
 0x779   :  { %v4780_v18 = vpop.f32.mrb[99].mxu0 }
 0x77d   :  { %v5871_v23 = vpop.f32.mrb[96].mxu1 }
 0x77e   :  { %6215 = vst [vmem:[#allocation16_spill] sm:$0xff] %v5871_v23  ;;  %v3294_v61 = vpop.f32.mrb[100].mxu0  ;;  %v4785_v19 = vpop.f32.mrb[97].mxu1 }
 0x77f   :  { %v5875_v29 = vsel %vm5227_vm5, %v3294_v61, -1e+30  ;;  %v4791_v3 = vpop.f32.mrb[101].mxu0  ;;  %v3108_v6 = vpop.f32.mrb[98].mxu1 }
 0x780   :  { %v3665_v14 = vsel %vm156_vm3, %v5875_v29, -inf  ;;  %v3297_v7 = vpop.f32.mrb[102].mxu0  ;;  %v4786_v48 = vpop.f32.mrb[99].mxu1 }
 0x781   :  { %3666 = vmax.xlane.f32.xlu0 %v3665_v14  ;;  %v4792_v35 = vpop.f32.mrb[103].mxu0 }
 0x785   :  { %v3345_v42 = vpop.f32.mrb[100].mxu1 }
 0x786   :  { %v5881_v10 = vsel %vm5227_vm5, %v3345_v42, -1e+30  ;;  %v3396_v37 = vpop.f32.mrb[104].mxu0  ;;  %v4797_v19 = vpop.f32.mrb[101].mxu1 }
 0x787   :  { %v3668_v61 = vsel %vm156_vm3, %v5881_v10, -inf  ;;  %v5887_v15 = vsel %vm5227_vm5, %v3396_v37, -1e+30  ;;  %v4803_v18 = vpop.f32.mrb[105].mxu0  ;;  %v3348_v3 = vpop.f32.mrb[102].mxu1 }
 0x788   :  { %v3671_v6 = vsel %vm156_vm3, %v5887_v15, -inf  ;;  %v3399_v14 = vpop.f32.mrb[106].mxu0  ;;  %3669 = vmax.xlane.f32.xlu1 %v3668_v61  ;;  %v4798_v7 = vpop.f32.mrb[103].mxu1 }
 0x789   :  { %3672 = vmax.xlane.f32.xlu0 %v3671_v6  ;;  %v4804_v48 = vpop.f32.mrb[107].mxu0 }
 0x78d   :  { %v3447_v35 = vpop.f32.mrb[104].mxu1 }
 0x78e   :  { %v5893_v42 = vsel %vm5227_vm5, %v3447_v35, -1e+30  ;;  %v3498_v19 = vpop.f32.mrb[108].mxu0  ;;  %v4809_v23 = vpop.f32.mrb[105].mxu1 }
 0x78f   :  { %v3674_v37 = vsel %vm156_vm3, %v5893_v42, -inf  ;;  %v4815_v18 = vpop.f32.mrb[109].mxu0  ;;  %v3450_v3 = vpop.f32.mrb[106].mxu1 }
 0x790   :  { %v3501_v2 = vpop.f32.mrb[110].mxu0  ;;  %3675 = vmax.xlane.f32.xlu0 %v3674_v37  ;;  %v4810_v17 = vpop.f32.mrb[107].mxu1  ;;  %v604_v37 = vsel %vm156_vm3, %v5317_v9, 0.0  ;;  %v2688_v9 = vsel %vm156_vm3, %v5770_v25, 0.0  ;;  %v2691_v25 = vsel %vm156_vm3, %v5772_v52, 0.0 }
 0x791   :  { %v4816_v14 = vpop.f32.mrb[111].mxu0  ;;  %v5903_v2 = vsel %vm5227_vm5, %v3498_v19, -1e+30  ;;  %v2682_v19 = vsel %vm156_vm3, %v5751_v54, 0.0  ;;  %v2679_v54 = vsel %vm156_vm3, %v5740_v8, 0.0  ;;  %v1654_v8 = vsel %vm156_vm3, %v5562_v58, 0.0 }
 0x792   :  { %v3677_v17 = vsel %vm156_vm3, %v5903_v2, -inf }
 0x795   :  { %v3549_v61 = vpop.f32.mrb[108].mxu1 }
 0x796   :  { %v3600_v7 = vpop.f32.mrb[112].mxu0  ;;  %v4821_v6 = vpop.f32.mrb[109].mxu1 }
 0x797   :  { %v4827_v48 = vpop.f32.mrb[113].mxu0  ;;  %v3552_v0 = vpop.f32.mrb[110].mxu1 }
 0x798   :  { %v3603_v33 = vpop.f32.mrb[114].mxu0  ;;  %v4822_v59 = vpop.f32.mrb[111].mxu1  ;;  %v607_v0 = vsel %vm156_vm3, %v5325_v11, 0.0  ;;  %v613_v11 = vsel %vm156_vm3, %v5344_v21, 0.0  ;;  %v1651_v21 = vsel %vm156_vm3, %v5545_v53, 0.0 }
 0x799   :  { %v4828_v35 = vpop.f32.mrb[115].mxu0  ;;  %4001 = vrot.lane.b32.xlu1 %v5720_v39, %s5068_s13  ;;  %v5909_v59 = vsel %vm5227_vm5, %v3600_v7, -1e+30  ;;  %v5915_v33 = vsel %vm5227_vm5, %v3549_v61, -1e+30  ;;  %v619_v7 = vsel %vm156_vm3, %v5354_v27, 0.0 }
 0x79d   :  { %v3651_v23 = vpop.f32.mrb[112].mxu1 }
 0x79e   :  { %v4833_v32 = vpop.f32.mrb[113].mxu1  ;;  %v5921_v39 = vsel %vm5227_vm5, %v3651_v23, -1e+30  ;;  %v2694_v23 = vsel %vm156_vm3, %v5788_v43, 0.0 }
 0x79f   :  { %v3654_v38 = vpop.f32.mrb[114].mxu1  ;;  %v3683_v32 = vsel %vm156_vm3, %v5909_v59, -inf }
 0x7a0   :  { %v4834_v18 = vpop.f32.mrb[115].mxu1  ;;  %v3686_v38 = vsel %vm156_vm3, %v5921_v39, -inf }
 0x7a1   :  { %v1660_v18 = vsel %vm156_vm3, %v5580_v13, 0.0 }
 0x7a6   :  { %3953 = vrot.lane.b32.xlu0 %v5717_v28, %s5068_s13  ;;  %v3680_v28 = vsel %vm156_vm3, %v5915_v33, -inf }
 0x7bd   :  { %3678 = vmax.xlane.f32.xlu1 %v3677_v17 }
 0x7c1   :  { %3684 = vmax.xlane.f32.xlu1 %v3683_v32 }
 0x7c5   :  { %3681 = vmax.xlane.f32.xlu0 %v3680_v28  ;;  %v2697_v28 = vsel %vm156_vm3, %v5799_v51, 0.0 }
 0x7c9   :  { %3687 = vmax.xlane.f32.xlu0 %v3686_v38  ;;  %v6216_v38 = vmov 0.0  }
 0x7d2   :  { %4097 = vrot.lane.b32.xlu1 %v5726_v49, %s5068_s13  ;;  %v2685_v49 = vsel %vm156_vm3, %v5753_v57, 0.0  ;;  %v3858_v57 = vpop.permute.xlu1 %3857 }
 0x7d3   :  { %v3863_v32 = vsel %vm657_vm4, %v3858_v57, 0 }
 0x7d6   :  { %v3906_v14 = vpop.permute.xlu1 %3905 }
 0x7df   :  { %4049 = vrot.lane.b32.xlu0 %v5723_v30, %s5068_s13  ;;  %v610_v30 = vsel %vm156_vm3, %v5328_v12, 0.0  ;;  %v616_v12 = vsel %vm156_vm3, %v5365_v45, 0.0  ;;  %v5069_v45 = vmov 0  }
 0x7e0   :  { %4901 = vset.pattern.permute.xlu0 %v5069_v45  ;;  %4900 = vset.pattern.permute.xlu1 %v5069_v45 }
 0x7f6   :  { %608 = vadd.xlane.f32.xlu1 %v607_v0 }
 0x7fa   :  { %1649 = vadd.xlane.f32.xlu1 %v1648_v62  ;;  %v625_v62 = vsel %vm156_vm3, %v5384_v60, 0.0 }
 0x7fe   :  { %2683 = vadd.xlane.f32.xlu1 %v2682_v19  ;;  %605 = vadd.xlane.f32.xlu0 %v604_v37  ;;  %v3911_v37 = vsel %vm657_vm4, %v3906_v14, 0 }
 0x802   :  { %2686 = vadd.xlane.f32.xlu1 %v2685_v49  ;;  %611 = vadd.xlane.f32.xlu0 %v610_v30  ;;  %v2700_v30 = vsel %vm156_vm3, %v5808_v1, 0.0 }
 0x806   :  { %614 = vadd.xlane.f32.xlu1 %v613_v11  ;;  %1646 = vadd.xlane.f32.xlu0 %v1645_v40 }
 0x80a   :  { %2689 = vadd.xlane.f32.xlu1 %v2688_v9  ;;  %2680 = vadd.xlane.f32.xlu0 %v2679_v54 }
 0x80e   :  { %v3667_v3 = vpop.xlane.xlu0 %3666  ;;  %617 = vadd.xlane.f32.xlu1 %v616_v12  ;;  %1652 = vadd.xlane.f32.xlu0 %v1651_v21 }
 0x80f   :  { %v3689_v47 = vsub.f32 %v5875_v29, %v3667_v3  ;;  %v1657_v29 = vsel %vm156_vm3, %v5564_v4, 0.0 }
 0x811   :  { %v3697_v61 = vmul.f32 1.442695, %v3689_v47 }
 0x812   :  { %2692 = vadd.xlane.f32.xlu1 %v2691_v25  ;;  %1655 = vadd.xlane.f32.xlu0 %v1654_v8 }
 0x813   :  { %4952 = vpow2.f32 %v3697_v61 }
 0x815   :  { %v3670_v53 = vpop.xlane.xlu1 %3669 }
 0x816   :  { %v3673_v6 = vpop.xlane.xlu0 %3672  ;;  %v3690_v48 = vsub.f32 %v5881_v10, %v3670_v53  ;;  %620 = vadd.xlane.f32.xlu1 %v619_v7  ;;  %1658 = vadd.xlane.f32.xlu0 %v1657_v29  ;;  %v622_v10 = vsel %vm156_vm3, %v5375_v55, 0.0  ;;  %v1666_v55 = vsel %vm156_vm3, %v5600_v20, 0.0 }
 0x817   :  { %v3691_v58 = vsub.f32 %v5887_v15, %v3673_v6  ;;  %v1663_v15 = vsel %vm156_vm3, %v5591_v36, 0.0 }
 0x818   :  { %v3699_v52 = vmul.f32 1.442695, %v3690_v48 }
 0x819   :  { %v3701_v35 = vmul.f32 1.442695, %v3691_v58  ;;  %v4002_v40 = vpop.permute.xlu1 %4001 }
 0x81a   :  { %4954 = vpow2.f32 %v3699_v52  ;;  %2695 = vadd.xlane.f32.xlu1 %v2694_v23  ;;  %1661 = vadd.xlane.f32.xlu0 %v1660_v18  ;;  %v4007_v57 = vsel %vm657_vm4, %v4002_v40, 0 }
 0x81b   :  { %4956 = vpow2.f32 %v3701_v35 }
 0x81d   :  { %v4953_v27 = vpop.eup %4952  ;;  %v3676_v4 = vpop.xlane.xlu0 %3675 }
 0x81e   :  { %v3692_v17 = vsub.f32 %v5893_v42, %v3676_v4  ;;  %623 = vadd.xlane.f32.xlu1 %v622_v10  ;;  %1664 = vadd.xlane.f32.xlu0 %v1663_v15  ;;  %v3753_v43 = vpack.c.bf16 %v4953_v27, %v4953_v27  ;;  %v3713_v19 = vsel %vm156_vm3, %v4953_v27, 0.0 }
 0x820   :  { %v3703_v13 = vmul.f32 1.442695, %v3692_v17  ;;  %4838 = vmatmul.mubr.msk.bf16.vlgmr.msra.gmra.mrb[116].mxu0 %vm156_vm3, %v3753_v43 }
 0x821   :  { %4848 = vmatpush3.bf16.msra.mxu0 %v3863_v32  ;;  %4849 = vmatprep.mubr.msk.bf16.mxu0 %vm5057_vm2, %v6216_v38  ;;  %v3954_v0 = vpop.permute.xlu0 %3953 }
 0x822   :  { %4958 = vpow2.f32 %v3703_v13  ;;  %2698 = vadd.xlane.f32.xlu1 %v2697_v28  ;;  %1667 = vadd.xlane.f32.xlu0 %v1666_v55  ;;  %v3959_v49 = vsel %vm657_vm4, %v3954_v0, 0  ;;  %v6026_v55 = vld [vmem:[%s6199_s2] sm:$0xff]  ;;  %s5070_s2 = smov [#allocation3]  }
 0x823   :  { %4859 = vmatprep.subr.bf16.mxu0 %v6216_v38  ;;  %s4272_s16 = sshll.u32 %s5070_s2, 4  ;;  %s4273_s16 = int_to_ptr.vmem [resolvable:$true] %s4272_s16 }
 0x824   :  { %v4955_v36 = vpop.eup %4954  ;;  %s5032_s17 = scalar_lea.vmem %s4273_s16, 512  ;;  %p5037_p1 = scmp.lt.s32.totalorder %s4273_s16, %s4273_s16 }
 0x825   :  { %v4957_v42 = vpop.eup %4956  ;;  %v3754_v51 = vpack.c.bf16 %v4955_v36, %v4955_v36  ;;  %v3716_v1 = vsel %vm156_vm3, %v4955_v36, 0.0  ;;  %p5033_p0 = scmp.ne.s32.totalorder %s4273_s16, %s5032_s17  ;;  %p5038_p2 = scmp.lt.s32.totalorder %s5032_s17, %s5032_s17 }
 0x826   :  { %626 = vadd.xlane.f32.xlu1 %v625_v62  ;;  %3714 = vadd.xlane.f32.xlu0 %v3713_v19  ;;  %v3755_v20 = vpack.c.bf16 %v4957_v42, %v4957_v42  ;;  %v3719_v60 = vsel %vm156_vm3, %v4957_v42, 0.0 }
 0x827   :  { %4844 = vmatmul.mubr.msk.bf16.vlgmr.msra.gmra.mrb[116].mxu1 %vm156_vm3, %v3754_v51  ;;  %p5039_p3 = por %p5038_p2, %p5037_p1 }
 0x828   :  { %4850 = vmatmul.mubr.msk.bf16.vlgmr.msra.gmra.mrb[120].mxu0 %vm156_vm3, %v3755_v20  ;;  %4854 = vmatpush3.bf16.msra.mxu1 %v3911_v37 }
 0x829   :  { %4860 = vmatpush3.bf16.msra.mxu0 %v3959_v49  ;;  %4855 = vmatprep.mubr.msk.bf16.mxu1 %vm5057_vm2, %v6216_v38  ;;  %p5040_p4 = pnand %p5039_p3, %p5033_p0 }
 0x82a   :  { %2701 = vadd.xlane.f32.xlu1 %v2700_v30  ;;  %3720 = vadd.xlane.f32.xlu0 %v3719_v60 }
 0x82b   :  { %4865 = vmatprep.subr.bf16.mxu1 %v6216_v38  ;;  %4861 = vmatprep.mubr.msk.bf16.mxu0 %vm5057_vm2, %v6216_v38 }
 0x82c   :  { %v4959_v11 = vpop.eup %4958  ;;  %4871 = vmatprep.subr.bf16.mxu0 %v6216_v38 }
 0x82d   :  { %v3722_v9 = vsel %vm156_vm3, %v4959_v11, 0.0  ;;  %v3756_v54 = vpack.c.bf16 %v4959_v11, %v4959_v11 }
 0x82e   :  { %3723 = vadd.xlane.f32.xlu0 %v3722_v9  ;;  %3717 = vadd.xlane.f32.xlu1 %v3716_v1 }
 0x82f   :  { %4856 = vmatmul.mubr.msk.bf16.vlgmr.msra.gmra.mrb[120].mxu1 %vm156_vm3, %v3756_v54 }
 0x830   :  { %4866 = vmatpush3.bf16.msra.mxu1 %v4007_v57  ;;  %4867 = vmatprep.mubr.msk.bf16.mxu1 %vm5057_vm2, %v6216_v38 }
 0x831   :  { %4877 = vmatprep.subr.bf16.mxu1 %v6216_v38 }
 0x84a   :  { %v3679_v12 = vpop.xlane.xlu1 %3678 }
 0x84b   :  { %v3693_v21 = vsub.f32 %v5903_v2, %v3679_v12 }
 0x84d   :  { %v3705_v3 = vmul.f32 1.442695, %v3693_v21 }
 0x84e   :  { %v3685_v47 = vpop.xlane.xlu1 %3684 }
 0x84f   :  { %4960 = vpow2.f32 %v3705_v3  ;;  %v3695_v14 = vsub.f32 %v5909_v59, %v3685_v47 }
 0x851   :  { %v3709_v61 = vmul.f32 1.442695, %v3695_v14 }
 0x852   :  { %v3682_v25 = vpop.xlane.xlu0 %3681  ;;  %v4098_v35 = vpop.permute.xlu1 %4097 }
 0x853   :  { %v3694_v8 = vsub.f32 %v5915_v33, %v3682_v25  ;;  %4962 = vpow2.f32 %v3709_v61  ;;  %v4103_v27 = vsel %vm657_vm4, %v4098_v35, 0 }
 0x855   :  { %v3707_v45 = vmul.f32 1.442695, %v3694_v8 }
 0x856   :  { %v3688_v53 = vpop.xlane.xlu0 %3687 }
 0x857   :  { %4964 = vpow2.f32 %v3707_v45  ;;  %v3696_v7 = vsub.f32 %v5921_v39, %v3688_v53 }
 0x859   :  { %v4961_v29 = vpop.eup %4960  ;;  %v3711_v6 = vmul.f32 1.442695, %v3696_v7 }
 0x85a   :  { %v4050_v48 = vpop.permute.xlu0 %4049  ;;  %v3725_v2 = vsel %vm156_vm3, %v4961_v29, 0.0  ;;  %v3757_v58 = vpack.c.bf16 %v4961_v29, %v4961_v29 }
 0x85b   :  { %v4055_v52 = vsel %vm657_vm4, %v4050_v48, 0  ;;  %3726 = vadd.xlane.f32.xlu0 %v3725_v2  ;;  %4966 = vpow2.f32 %v3711_v6 }
 0x85c   :  { %4862 = vmatmul.mubr.msk.bf16.vlgmr.msra.gmra.mrb[124].mxu0 %vm156_vm3, %v3757_v58 }
 0x85d   :  { %4872 = vmatpush3.bf16.msra.mxu0 %v4055_v52  ;;  %4873 = vmatprep.mubr.msk.bf16.mxu0 %vm5057_vm2, %v6216_v38  ;;  %v4963_v59 = vpop.eup %4962 }
 0x85e   :  { %v3759_v18 = vpack.c.bf16 %v4963_v59, %v4963_v59  ;;  %v3731_v4 = vsel %vm156_vm3, %v4963_v59, 0.0 }
 0x861   :  { %v4965_v33 = vpop.eup %4964 }
 0x862   :  { %v3728_v39 = vsel %vm156_vm3, %v4965_v33, 0.0  ;;  %v3758_v23 = vpack.c.bf16 %v4965_v33, %v4965_v33 }
 0x863   :  { %3729 = vadd.xlane.f32.xlu0 %v3728_v39 }
 0x864   :  { %4868 = vmatmul.mubr.msk.bf16.vlgmr.msra.gmra.mrb[124].mxu1 %vm156_vm3, %v3758_v23  ;;  %4874 = vmatmul.mubr.msk.bf16.vlgmr.msra.gmra.mrb[128].mxu0 %vm156_vm3, %v3759_v18 }
 0x865   :  { %4878 = vmatpush3.bf16.msra.mxu1 %v4103_v27  ;;  %4879 = vmatprep.mubr.msk.bf16.mxu1 %vm5057_vm2, %v6216_v38  ;;  %v4967_v10 = vpop.eup %4966 }
 0x866   :  { %v3734_v15 = vsel %vm156_vm3, %v4967_v10, 0.0  ;;  %v3760_v17 = vpack.c.bf16 %v4967_v10, %v4967_v10 }
 0x867   :  { %3732 = vadd.xlane.f32.xlu0 %v3731_v4 }
 0x86b   :  { %3735 = vadd.xlane.f32.xlu0 %v3734_v15 }
 0x86c   :  { %4880 = vmatmul.mubr.msk.bf16.vlgmr.msra.gmra.mrb[128].mxu1 %vm156_vm3, %v3760_v17 }
 0x883   :  { %v609_v43 = vpop.xlane.xlu1 %608 }
 0x884   :  { %4968 = vrcp.f32 %v609_v43 }
 0x887   :  { %v1650_v32 = vpop.xlane.xlu1 %1649 }
 0x88b   :  { %v606_v13 = vpop.xlane.xlu0 %605  ;;  %v2684_v28 = vpop.xlane.xlu1 %2683 }
 0x88c   :  { %4970 = vrcp.f32 %v606_v13 }
 0x88e   :  { %v4969_v38 = vpop.eup %4968 }
 0x88f   :  { %v612_v36 = vpop.xlane.xlu0 %611  ;;  %v2687_v42 = vpop.xlane.xlu1 %2686  ;;  %v637_v0 = vmul.f32 %v4969_v38, %v6026_v55 }
 0x890   :  { %4972 = vrcp.f32 %v2687_v42 }
 0x891   :  { %1044 = vperm.xlu0 %4901, %v637_v0  }
 0x893   :  { %v1647_v62 = vpop.xlane.xlu0 %1646  ;;  %v615_v19 = vpop.xlane.xlu1 %614 }
 0x894   :  { %4974 = vrcp.f32 %v1647_v62 }
 0x895   :  { %4976 = vrcp.f32 %v615_v19 }
 0x896   :  { %v4971_v51 = vpop.eup %4970  ;;  %4978 = vrcp.f32 %v1650_v32 }
 0x897   :  { %v2681_v20 = vpop.xlane.xlu0 %2680  ;;  %v2690_v37 = vpop.xlane.xlu1 %2689  ;;  %v636_v49 = vmul.f32 %v4971_v51, %v6026_v55 }
 0x898   :  { %4980 = vrcp.f32 %v2690_v37 }
 0x899   :  { %1039 = vperm.xlu1 %4900, %v636_v49   ;;  %4982 = vrcp.f32 %v2681_v20 }
 0x89a   :  { %v4973_v30 = vpop.eup %4972 }
 0x89b   :  { %v1653_v60 = vpop.xlane.xlu0 %1652  ;;  %v618_v11 = vpop.xlane.xlu1 %617  ;;  %v2713_v40 = vmul.f32 %v4973_v30, %v6026_v55 }
 0x89c   :  { %4984 = vrcp.f32 %v618_v11 }
 0x89d   :  { %4986 = vrcp.f32 %v2684_v28  ;;  %3123 = vperm.xlu0 %4901, %v2713_v40  }
 0x89e   :  { %v4975_v9 = vpop.eup %4974 }
 0x89f   :  { %v4977_v1 = vpop.eup %4976  ;;  %v1656_v54 = vpop.xlane.xlu0 %1655  ;;  %v1677_v12 = vmul.f32 %v4975_v9, %v6026_v55 }
 0x8a0   :  { %v2693_v57 = vpop.xlane.xlu1 %2692  ;;  %v4979_v21 = vpop.eup %4978  ;;  %v639_v3 = vmul.f32 %v4977_v1, %v6026_v55 }
 0x8a1   :  { %4988 = vrcp.f32 %v2693_v57  ;;  %2079 = vperm.xlu1 %4900, %v1677_v12   ;;  %v1678_v25 = vmul.f32 %v4979_v21, %v6026_v55 }
 0x8a2   :  { %4990 = vrcp.f32 %v612_v36  ;;  %1054 = vperm.xlu0 %4901, %v639_v3   ;;  %v4981_v47 = vpop.eup %4980 }
 0x8a3   :  { %v1659_v14 = vpop.xlane.xlu0 %1658  ;;  %v4983_v8 = vpop.eup %4982  ;;  %v2714_v45 = vmul.f32 %v4981_v47, %v6026_v55 }
 0x8a4   :  { %v621_v61 = vpop.xlane.xlu1 %620  ;;  %v2711_v29 = vmul.f32 %v4983_v8, %v6026_v55 }
 0x8a5   :  { %4992 = vrcp.f32 %v621_v61  ;;  %2084 = vperm.xlu1 %4900, %v1678_v25  }
 0x8a6   :  { %4994 = vrcp.f32 %v1653_v60  ;;  %3128 = vperm.xlu0 %4901, %v2714_v45   ;;  %v4985_v53 = vpop.eup %4984 }
 0x8a7   :  { %v4987_v6 = vpop.eup %4986  ;;  %v640_v48 = vmul.f32 %v4985_v53, %v6026_v55  ;;  %v1662_v2 = vpop.xlane.xlu0 %1661 }
 0x8a8   :  { %v2696_v7 = vpop.xlane.xlu1 %2695  ;;  %v2712_v59 = vmul.f32 %v4987_v6, %v6026_v55 }
 0x8a9   :  { %4996 = vrcp.f32 %v2696_v7  ;;  %3113 = vperm.xlu1 %4900, %v2711_v29  }
 0x8aa   :  { %4998 = vrcp.f32 %v1656_v54  ;;  %1059 = vperm.xlu0 %4901, %v640_v48  }
 0x8ab   :  { %v4989_v58 = vpop.eup %4988  ;;  %v1665_v23 = vpop.xlane.xlu0 %1664 }
 0x8ac   :  { %v624_v52 = vpop.xlane.xlu1 %623  ;;  %v4991_v33 = vpop.eup %4990  ;;  %v2715_v35 = vmul.f32 %v4989_v58, %v6026_v55 }
 0x8ad   :  { %5000 = vrcp.f32 %v624_v52  ;;  %3118 = vperm.xlu1 %4900, %v2712_v59   ;;  %v638_v27 = vmul.f32 %v4991_v33, %v6026_v55 }
 0x8ae   :  { %5002 = vrcp.f32 %v1659_v14  ;;  %3133 = vperm.xlu0 %4901, %v2715_v35  }
 0x8af   :  { %v4993_v39 = vpop.eup %4992  ;;  %v1668_v28 = vpop.xlane.xlu0 %1667 }
 0x8b0   :  { %v2699_v18 = vpop.xlane.xlu1 %2698  ;;  %v4995_v4 = vpop.eup %4994  ;;  %v641_v10 = vmul.f32 %v4993_v39, %v6026_v55 }
 0x8b1   :  { %5004 = vrcp.f32 %v2699_v18  ;;  %1049 = vperm.xlu1 %4900, %v638_v27   ;;  %v1679_v43 = vmul.f32 %v4995_v4, %v6026_v55 }
 0x8b2   :  { %5006 = vrcp.f32 %v1662_v2  ;;  %1064 = vperm.xlu0 %4901, %v641_v10  }
 0x8b3   :  { %v4997_v15 = vpop.eup %4996  ;;  %v3715_v51 = vpop.xlane.xlu0 %3714 }
 0x8b4   :  { %v627_v17 = vpop.xlane.xlu1 %626  ;;  %v4999_v32 = vpop.eup %4998  ;;  %v2716_v13 = vmul.f32 %v4997_v15, %v6026_v55 }
 0x8b5   :  { %5008 = vrcp.f32 %v627_v17  ;;  %2089 = vperm.xlu1 %4900, %v1679_v43   ;;  %v1680_v42 = vmul.f32 %v4999_v32, %v6026_v55 }
 0x8b6   :  { %5010 = vrcp.f32 %v1665_v23  ;;  %3138 = vperm.xlu0 %4901, %v2716_v13  }
 0x8b7   :  { %v5001_v38 = vpop.eup %5000  ;;  %v3721_v1 = vpop.xlane.xlu0 %3720 }
 0x8b8   :  { %v2702_v36 = vpop.xlane.xlu1 %2701  ;;  %v5003_v0 = vpop.eup %5002  ;;  %v642_v62 = vmul.f32 %v5001_v38, %v6026_v55 }
 0x8b9   :  { %5012 = vrcp.f32 %v2702_v36  ;;  %2094 = vperm.xlu1 %4900, %v1680_v42   ;;  %v1681_v20 = vmul.f32 %v5003_v0, %v6026_v55 }
 0x8ba   :  { %5014 = vrcp.f32 %v1668_v28  ;;  %1069 = vperm.xlu0 %4901, %v642_v62  }
 0x8bb   :  { %v5005_v19 = vpop.eup %5004  ;;  %5016 = vrcp.f32 %v3715_v51  ;;  %v3724_v3 = vpop.xlane.xlu0 %3723 }
 0x8bc   :  { %v5007_v37 = vpop.eup %5006  ;;  %v2717_v49 = vmul.f32 %v5005_v19, %v6026_v55  ;;  %v3718_v60 = vpop.xlane.xlu1 %3717 }
 0x8bd   :  { %2099 = vperm.xlu1 %4900, %v1681_v20   ;;  %v1682_v11 = vmul.f32 %v5007_v37, %v6026_v55  ;;  %5018 = vrcp.f32 %v3718_v60 }
 0x8be   :  { %3143 = vperm.xlu0 %4901, %v2717_v49   ;;  %5020 = vrcp.f32 %v3721_v1 }
 0x8bf   :  { %v5009_v30 = vpop.eup %5008  ;;  %5022 = vrcp.f32 %v3724_v3 }
 0x8c0   :  { %v5011_v40 = vpop.eup %5010  ;;  %v643_v9 = vmul.f32 %v5009_v30, %v6026_v55 }
 0x8c1   :  { %2104 = vperm.xlu1 %4900, %v1682_v11   ;;  %v1683_v57 = vmul.f32 %v5011_v40, %v6026_v55 }
 0x8c2   :  { %1074 = vperm.xlu0 %4901, %v643_v9  }
 0x8c3   :  { %v5013_v54 = vpop.eup %5012 }
 0x8c4   :  { %v5015_v12 = vpop.eup %5014  ;;  %v2718_v21 = vmul.f32 %v5013_v54, %v6026_v55 }
 0x8c5   :  { %2109 = vperm.xlu1 %4900, %v1683_v57   ;;  %v1684_v47 = vmul.f32 %v5015_v12, %v6026_v55  ;;  %v5017_v14 = vpop.eup %5016 }
 0x8c6   :  { %3148 = vperm.xlu0 %4901, %v2718_v21   ;;  %v3745_v61 = vmul.f32 %v5017_v14, %v6026_v55 }
 0x8c7   :  { %v5019_v25 = vpop.eup %5018 }
 0x8c8   :  { %v3746_v8 = vmul.f32 %v5019_v25, %v6026_v55  ;;  %v5021_v45 = vpop.eup %5020 }
 0x8c9   :  { %2114 = vperm.xlu1 %4900, %v1684_v47   ;;  %v3747_v53 = vmul.f32 %v5021_v45, %v6026_v55  ;;  %v5023_v7 = vpop.eup %5022 }
 0x8ca   :  { %v3748_v29 = vmul.f32 %v5023_v7, %v6026_v55 }
 0x8cd   :  { %4147 = vperm.xlu1 %4900, %v3745_v61  }
 0x8d1   :  { %4152 = vperm.xlu1 %4900, %v3746_v8  }
 0x8d5   :  { %4157 = vperm.xlu1 %4900, %v3747_v53  }
 0x8d9   :  { %4162 = vperm.xlu1 %4900, %v3748_v29  }
 0x8e8   :  { %v3727_v6 = vpop.xlane.xlu0 %3726 }
 0x8e9   :  { %5024 = vrcp.f32 %v3727_v6 }
 0x8f0   :  { %v3730_v48 = vpop.xlane.xlu0 %3729 }
 0x8f1   :  { %5026 = vrcp.f32 %v3730_v48 }
 0x8f3   :  { %v5025_v2 = vpop.eup %5024  ;;  %v6056_v58 = vpop.f32.mrb[116].mxu0 }
 0x8f4   :  { %v4839_v52 = vpop.f32.mrb[117].mxu0  ;;  %v3733_v59 = vpop.xlane.xlu0 %3732  ;;  %v3749_v33 = vmul.f32 %v5025_v2, %v6026_v55 }
 0x8f5   :  { %v3806_v35 = vpop.f32.mrb[118].mxu0  ;;  %5028 = vrcp.f32 %v3733_v59 }
 0x8f6   :  { %v4840_v39 = vpop.f32.mrb[119].mxu0  ;;  %4167 = vperm.xlu1 %4900, %v3749_v33  }
 0x8f8   :  { %v3736_v23 = vpop.xlane.xlu0 %3735 }
 0x8f9   :  { %5030 = vrcp.f32 %v3736_v23 }
 0x8fa   :  { %v6059_v18 = vpop.f32.mrb[116].mxu1 }
 0x8fb   :  { %v5027_v27 = vpop.eup %5026  ;;  %v6061_v4 = vpop.f32.mrb[120].mxu0 }
 0x8fc   :  { %v4845_v10 = vpop.f32.mrb[117].mxu1  ;;  %v4851_v15 = vpop.f32.mrb[121].mxu0  ;;  %v3750_v43 = vmul.f32 %v5027_v27, %v6026_v55 }
 0x8fd   :  { %v3854_v17 = vpop.f32.mrb[118].mxu1  ;;  %v3902_v32 = vpop.f32.mrb[122].mxu0 }
 0x8fe   :  { %v4846_v13 = vpop.f32.mrb[119].mxu1  ;;  %v4852_v28 = vpop.f32.mrb[123].mxu0  ;;  %4172 = vperm.xlu1 %4900, %v3750_v43  }
 0x8ff   :  { %v5029_v38 = vpop.eup %5028 }
 0x900   :  { %v3751_v36 = vmul.f32 %v5029_v38, %v6026_v55 }
 0x902   :  { %v6065_v42 = vpop.f32.mrb[120].mxu1  ;;  %4177 = vperm.xlu1 %4900, %v3751_v36  }
 0x903   :  { %v5031_v0 = vpop.eup %5030  ;;  %v4857_v62 = vpop.f32.mrb[121].mxu1 }
 0x904   :  { %v3950_v19 = vpop.f32.mrb[122].mxu1  ;;  %v3752_v51 = vmul.f32 %v5031_v0, %v6026_v55 }
 0x905   :  { %v4858_v20 = vpop.f32.mrb[123].mxu1 }
 0x906   :  { %4182 = vperm.xlu1 %4900, %v3752_v51  }
 0x910   :  { %v1045_v37 = vpop.permute.xlu0 %1044 }
 0x911   :  { %v1078_v49 = vmul.f32 %v1045_v37, %v5435_v34 }
 0x913   :  { %v1092_v30 = vsel %vm156_vm3, %v1078_v49, 0.0 }
 0x914   :  { %v1093_v60 = vrot.slane %v1092_v30, 4 }
 0x916   :  { %v1094_v11 = vadd.f32 %v1093_v60, %v1092_v30 }
 0x918   :  { %v1040_v40 = vpop.permute.xlu1 %1039  ;;  %v1095_v1 = vrot.slane %v1094_v11, 2 }
 0x919   :  { %v1077_v9 = vmul.f32 %v1040_v40, %v5433_v26 }
 0x91a   :  { %v1096_v21 = vadd.f32 %v1095_v1, %v1094_v11 }
 0x91b   :  { %v1085_v54 = vsel %vm156_vm3, %v1077_v9, 0.0 }
 0x91c   :  { %v1086_v57 = vrot.slane %v1085_v54, 4  ;;  %v3124_v12 = vpop.permute.xlu0 %3123  ;;  %v1097_v45 = vrot.slane %v1096_v21, 1 }
 0x91d   :  { %v3153_v55 = vmul.f32 %v3124_v12, %v5861_v5 }
 0x91e   :  { %v1087_v3 = vadd.f32 %v1086_v57, %v1085_v54  ;;  %v1098_v39 = vadd.f32 %v1097_v45, %v1096_v21 }
 0x91f   :  { %v3173_v14 = vsel %vm156_vm3, %v3153_v55, 0.0 }
 0x920   :  { %v1088_v47 = vrot.slane %v1087_v3, 2  ;;  %v2080_v34 = vpop.permute.xlu1 %2079  ;;  %v3174_v61 = vrot.slane %v3173_v14, 4 }
 0x921   :  { %v1055_v25 = vpop.permute.xlu0 %1054  ;;  %v2117_v8 = vmul.f32 %v2080_v34, %v5649_v24 }
 0x922   :  { %v1089_v53 = vadd.f32 %v1088_v47, %v1087_v3  ;;  %v1080_v26 = vmul.f32 %v1055_v25, %v5439_v46  ;;  %v3175_v7 = vadd.f32 %v3174_v61, %v3173_v14 }
 0x923   :  { %v2125_v29 = vsel %vm156_vm3, %v2117_v8, 0.0 }
 0x924   :  { %v1090_v6 = vrot.slane %v1089_v53, 1  ;;  %v1106_v48 = vsel %vm156_vm3, %v1080_v26, 0.0  ;;  %v2126_v2 = vrot.slane %v2125_v29, 4  ;;  %v2085_v5 = vpop.permute.xlu1 %2084  ;;  %v3176_v52 = vrot.slane %v3175_v7, 2 }
 0x925   :  { %v1107_v59 = vrot.slane %v1106_v48, 4  ;;  %v3129_v33 = vpop.permute.xlu0 %3128  ;;  %v2118_v35 = vmul.f32 %v2085_v5, %v5651_v31 }
 0x926   :  { %v1091_v24 = vadd.f32 %v1090_v6, %v1089_v53  ;;  %v2127_v23 = vadd.f32 %v2126_v2, %v2125_v29  ;;  %v3154_v27 = vmul.f32 %v3129_v33, %v5863_v22  ;;  %v3177_v28 = vadd.f32 %v3176_v52, %v3175_v7 }
 0x927   :  { %v1108_v46 = vadd.f32 %v1107_v59, %v1106_v48  ;;  %v2132_v10 = vsel %vm156_vm3, %v2118_v35, 0.0 }
 0x928   :  { %v6082_v15 = vsel %vm1149_vm6, %v1098_v39, %v1091_v24  ;;  %v2128_v17 = vrot.slane %v2127_v23, 2  ;;  %v3180_v43 = vsel %vm156_vm3, %v3154_v27, 0.0  ;;  %v2133_v32 = vrot.slane %v2132_v10, 4  ;;  %v3114_v13 = vpop.permute.xlu1 %3113 }
 0x929   :  { %v1109_v38 = vrot.slane %v1108_v46, 2  ;;  %v3181_v36 = vrot.slane %v3180_v43, 4  ;;  %v1060_v31 = vpop.permute.xlu0 %1059  ;;  %v3151_v0 = vmul.f32 %v3114_v13, %v5857_v16  ;;  %v3178_v9 = vrot.slane %v3177_v28, 1 }
 0x92a   :  { %v2129_v62 = vadd.f32 %v2128_v17, %v2127_v23  ;;  %v2134_v19 = vadd.f32 %v2133_v32, %v2132_v10  ;;  %v1081_v22 = vmul.f32 %v1060_v31, %v5443_v56 }
 0x92b   :  { %v1110_v51 = vadd.f32 %v1109_v38, %v1108_v46  ;;  %v3182_v20 = vadd.f32 %v3181_v36, %v3180_v43  ;;  %v3159_v37 = vsel %vm156_vm3, %v3151_v0, 0.0  ;;  %v3179_v39 = vadd.f32 %v3178_v9, %v3177_v28  ;;  %v6217_v0 = vld [vmem:[#allocation14_spill] sm:$0xff] }
 0x92c   :  { %v2130_v49 = vrot.slane %v2129_v62, 1  ;;  %v2135_v30 = vrot.slane %v2134_v19, 2  ;;  %v1113_v60 = vsel %vm156_vm3, %v1081_v22, 0.0  ;;  %v3160_v11 = vrot.slane %v3159_v37, 4  ;;  %v3119_v40 = vpop.permute.xlu1 %3118 }
 0x92d   :  { %v3183_v1 = vrot.slane %v3182_v20, 2  ;;  %v1114_v54 = vrot.slane %v1113_v60, 4  ;;  %v3134_v57 = vpop.permute.xlu0 %3133  ;;  %v3152_v16 = vmul.f32 %v3119_v40, %v5859_v63  ;;  %v1111_v12 = vrot.slane %v1110_v51, 1 }
 0x92e   :  { %v2136_v21 = vadd.f32 %v2135_v30, %v2134_v19  ;;  %v3161_v3 = vadd.f32 %v3160_v11, %v3159_v37  ;;  %v3155_v56 = vmul.f32 %v3134_v57, %v5865_v44  ;;  %v2131_v55 = vadd.f32 %v2130_v49, %v2129_v62  ;;  %v6218_v19 = vld [vmem:[#allocation8_spill] sm:$0xff] }
 0x92f   :  { %v3184_v47 = vadd.f32 %v3183_v1, %v3182_v20  ;;  %v1115_v14 = vadd.f32 %v1114_v54, %v1113_v60  ;;  %v3166_v34 = vsel %vm156_vm3, %v3152_v16, 0.0  ;;  %v6092_v61 = vpop.f32.mrb[124].mxu0  ;;  %v6104_v32 = vadd.f32 %v1111_v12, %v1110_v51 }
 0x930   :  { %v2137_v25 = vrot.slane %v2136_v21, 1  ;;  %v3162_v8 = vrot.slane %v3161_v3, 2  ;;  %v3187_v45 = vsel %vm156_vm3, %v3155_v56, 0.0  ;;  %v3167_v53 = vrot.slane %v3166_v34, 4  ;;  %v4863_v26 = vpop.f32.mrb[125].mxu0  ;;  %v1050_v7 = vpop.permute.xlu1 %1049 }
 0x931   :  { %v3185_v63 = vrot.slane %v3184_v47, 1  ;;  %v1116_v29 = vrot.slane %v1115_v14, 2  ;;  %v3188_v6 = vrot.slane %v3187_v45, 4  ;;  %v1065_v48 = vpop.permute.xlu0 %1064  ;;  %v1079_v44 = vmul.f32 %v1050_v7, %v5437_v41  ;;  %v3998_v2 = vpop.f32.mrb[126].mxu0 }
 0x932   :  { %v2138_v5 = vadd.f32 %v2137_v25, %v2136_v21  ;;  %v3163_v52 = vadd.f32 %v3162_v8, %v3161_v3  ;;  %v3168_v59 = vadd.f32 %v3167_v53, %v3166_v34  ;;  %v1082_v33 = vmul.f32 %v1065_v48, %v5441_v50  ;;  %v4864_v35 = vpop.f32.mrb[127].mxu0  ;;  %v6219_v34 = vld [vmem:[#allocation6_spill] sm:$0xff]  ;;  %v6220_v8 = vld [vmem:[#allocation9_spill] sm:$0xff] }
 0x933   :  { %v6097_v24 = vadd.f32 %v1116_v29, %v1115_v14  ;;  %v3189_v23 = vadd.f32 %v3188_v6, %v3187_v45  ;;  %v1099_v27 = vsel %vm156_vm3, %v1079_v44, 0.0  ;;  %v3186_v36 = vadd.f32 %v3185_v63, %v3184_v47 }
 0x934   :  { %v6101_v46 = vsel %vm1149_vm6, %v2138_v5, %v2131_v55  ;;  %v3164_v10 = vrot.slane %v3163_v52, 1  ;;  %v3169_v41 = vrot.slane %v3168_v59, 2  ;;  %v1120_v17 = vsel %vm156_vm3, %v1082_v33, 0.0  ;;  %v2090_v43 = vpop.permute.xlu1 %2089 }
 0x935   :  { %v3190_v50 = vrot.slane %v3189_v23, 2  ;;  %v1121_v13 = vrot.slane %v1120_v17, 4  ;;  %v1100_v28 = vrot.slane %v1099_v27, 4  ;;  %v3139_v38 = vpop.permute.xlu0 %3138  ;;  %v2119_v22 = vmul.f32 %v2090_v43, %v6218_v19 }
 0x936   :  { %v3170_v31 = vadd.f32 %v3169_v41, %v3168_v59  ;;  %v3156_v62 = vmul.f32 %v3139_v38, %v6217_v0  ;;  %v1118_v20 = vrot.slane %v6097_v24, 1  ;;  %v3165_v51 = vadd.f32 %v3164_v10, %v3163_v52 }
 0x937   :  { %v3191_v37 = vadd.f32 %v3190_v50, %v3189_v23  ;;  %v1122_v49 = vadd.f32 %v1121_v13, %v1120_v17  ;;  %v1101_v30 = vadd.f32 %v1100_v28, %v1099_v27  ;;  %v6109_v60 = vpop.f32.mrb[124].mxu1  ;;  %v6111_v11 = vpop.f32.mrb[128].mxu0  ;;  %v2139_v1 = vsel %vm156_vm3, %v2119_v22, 0.0 }
 0x938   :  { %v3171_v40 = vrot.slane %v3170_v31, 1  ;;  %v3194_v9 = vsel %vm156_vm3, %v3156_v62, 0.0  ;;  %v4869_v54 = vpop.f32.mrb[125].mxu1  ;;  %v4875_v57 = vpop.f32.mrb[129].mxu0  ;;  %v2140_v14 = vrot.slane %v2139_v1, 4  ;;  %v1119_v28 = vadd.f32 %v1118_v20, %v6097_v24 }
 0x939   :  { %v3192_v16 = vrot.slane %v3191_v37, 1  ;;  %v1123_v12 = vrot.slane %v1122_v49, 2  ;;  %v1102_v21 = vrot.slane %v1101_v30, 2  ;;  %v3195_v3 = vrot.slane %v3194_v9, 4  ;;  %v1070_v56 = vpop.permute.xlu0 %1069  ;;  %v2095_v55 = vpop.permute.xlu1 %2094 }
 0x93a   :  { %v3172_v47 = vadd.f32 %v3171_v40, %v3170_v31  ;;  %v1083_v25 = vmul.f32 %v1070_v56, %v6219_v34  ;;  %v2120_v45 = vmul.f32 %v2095_v55, %v6220_v8  ;;  %v4046_v53 = vpop.f32.mrb[126].mxu1  ;;  %v4094_v26 = vpop.f32.mrb[130].mxu0  ;;  %v2141_v5 = vadd.f32 %v2140_v14, %v2139_v1 }
 0x93b   :  { %v3193_v7 = vadd.f32 %v3192_v16, %v3191_v37  ;;  %v1124_v63 = vadd.f32 %v1123_v12, %v1122_v49  ;;  %v1103_v29 = vadd.f32 %v1102_v21, %v1101_v30  ;;  %v3196_v6 = vadd.f32 %v3195_v3, %v3194_v9  ;;  %v4870_v48 = vpop.f32.mrb[127].mxu1  ;;  %v4876_v44 = vpop.f32.mrb[131].mxu0  ;;  %v6221_v37 = vld [vmem:[#allocation15_spill] sm:$0xff]  ;;  %v6222_v9 = vld [vmem:[#allocation10_spill] sm:$0xff] }
 0x93c   :  { %v3223_v2 = vsel %vm1149_vm6, %v3172_v47, %v3165_v51  ;;  %v1127_v52 = vsel %vm156_vm3, %v1083_v25, 0.0  ;;  %v2146_v59 = vsel %vm156_vm3, %v2120_v45, 0.0  ;;  %v2142_v43 = vrot.slane %v2141_v5, 2  ;;  %v6223_v26 = vld [vmem:[#allocation7_spill] sm:$0xff] }
 0x93d   :  { %v3224_v33 = vsel %vm1151_vm7, %v3179_v39, %v3223_v2  ;;  %v1125_v35 = vrot.slane %v1124_v63, 1  ;;  %v1104_v23 = vrot.slane %v1103_v29, 1  ;;  %v3197_v27 = vrot.slane %v3196_v6, 2  ;;  %v3144_v10 = vpop.permute.xlu0 %3143  ;;  %v2100_v41 = vpop.permute.xlu1 %2099  ;;  %v6224_v2 = vld [vmem:[#allocation11_spill] sm:$0xff] }
 0x93e   :  { %v3225_v17 = vsel %vm1153_vm8, %v3186_v36, %v3224_v33  ;;  %v1128_v50 = vrot.slane %v1127_v52, 4  ;;  %v2147_v13 = vrot.slane %v2146_v59, 4  ;;  %v2143_v39 = vadd.f32 %v2142_v43, %v2141_v5 }
 0x93f   :  { %v1105_v38 = vadd.f32 %v1104_v23, %v1103_v29  ;;  %v3198_v31 = vadd.f32 %v3197_v27, %v3196_v6  ;;  %v3226_v0 = vsel %vm1155_vm9, %v3193_v7, %v3225_v17  ;;  %v6124_v62 = vpop.f32.mrb[128].mxu1  ;;  %v3157_v49 = vmul.f32 %v3144_v10, %v6221_v37 }
 0x940   :  { %v1129_v19 = vadd.f32 %v1128_v50, %v1127_v52  ;;  %v2148_v22 = vadd.f32 %v2147_v13, %v2146_v59  ;;  %v4881_v30 = vpop.f32.mrb[129].mxu1  ;;  %v1126_v51 = vadd.f32 %v1125_v35, %v1124_v63  ;;  %v2121_v24 = vmul.f32 %v2100_v41, %v6222_v9  ;;  %v6225_v35 = vld [vmem:[#allocation16_spill] sm:$0xff] }
 0x941   :  { %v1152_v36 = vsel %vm1151_vm7, %v1105_v38, %v6082_v15  ;;  %v3199_v40 = vrot.slane %v3198_v31, 1  ;;  %v1075_v20 = vpop.permute.xlu0 %1074  ;;  %v2105_v1 = vpop.permute.xlu1 %2104  ;;  %v2144_v57 = vrot.slane %v2143_v39, 1  ;;  %v3201_v55 = vsel %vm156_vm3, %v3157_v49, 0.0  ;;  %v6226_v49 = vld [vmem:[#allocation12_spill] sm:$0xff] }
 0x942   :  { %v1154_v54 = vsel %vm1153_vm8, %v6104_v32, %v1152_v36  ;;  %v1130_v16 = vrot.slane %v1129_v19, 2  ;;  %v2149_v12 = vrot.slane %v2148_v22, 2  ;;  %v4142_v21 = vpop.f32.mrb[130].mxu1  ;;  %v2153_v47 = vsel %vm156_vm3, %v2121_v24, 0.0 }
 0x943   :  { %v3200_v3 = vadd.f32 %v3199_v40, %v3198_v31  ;;  %v1156_v56 = vsel %vm1155_vm9, %v1119_v28, %v1154_v54  ;;  %v4882_v15 = vpop.f32.mrb[131].mxu1  ;;  %v2145_v14 = vadd.f32 %v2144_v57, %v2143_v39  ;;  %v3202_v32 = vrot.slane %v3201_v55, 4  ;;  %v6227_v40 = vld [vmem:[#allocation13_spill] sm:$0xff] }
 0x944   :  { %v1131_v34 = vadd.f32 %v1130_v16, %v1129_v19  ;;  %v1158_v25 = vsel %vm1157_vm10, %v1126_v51, %v1156_v56  ;;  %v2150_v8 = vadd.f32 %v2149_v12, %v2148_v22  ;;  %v2154_v53 = vrot.slane %v2153_v47, 4 }
 0x945   :  { %v3227_v45 = vsel %vm1157_vm10, %v3200_v3, %v3226_v0  ;;  %v1084_v7 = vmul.f32 %v1075_v20, %v6223_v26  ;;  %v3149_v63 = vpop.permute.xlu0 %3148  ;;  %v2110_v29 = vpop.permute.xlu1 %2109  ;;  %v2190_v6 = vsel %vm1151_vm7, %v2145_v14, %v6101_v46  ;;  %v2122_v5 = vmul.f32 %v2105_v1, %v6224_v2 }
 0x946   :  { %v1132_v48 = vrot.slane %v1131_v34, 1  ;;  %v2151_v44 = vrot.slane %v2150_v8, 1  ;;  %v3203_v52 = vadd.f32 %v3202_v32, %v3201_v55  ;;  %v2155_v59 = vadd.f32 %v2154_v53, %v2153_v47 }
 0x947   :  { %v1134_v33 = vsel %vm156_vm3, %v1084_v7, 0.0  ;;  %v3158_v23 = vmul.f32 %v3149_v63, %v6225_v35  ;;  %v2160_v17 = vsel %vm156_vm3, %v2122_v5, 0.0  ;;  %v2123_v30 = vmul.f32 %v2110_v29, %v6226_v49 }
 0x948   :  { %v1133_v27 = vadd.f32 %v1132_v48, %v1131_v34  ;;  %v2152_v10 = vadd.f32 %v2151_v44, %v2150_v8  ;;  %v1135_v41 = vrot.slane %v1134_v33, 4  ;;  %v3204_v43 = vrot.slane %v3203_v52, 2 }
 0x949   :  { %v2156_v50 = vrot.slane %v2155_v59, 2  ;;  %v2161_v13 = vrot.slane %v2160_v17, 4  ;;  %v3208_v46 = vsel %vm156_vm3, %v3158_v23, 0.0  ;;  %v2115_v28 = vpop.permute.xlu1 %2114  ;;  %v2167_v54 = vsel %vm156_vm3, %v2123_v30, 0.0 }
 0x94a   :  { %v1160_v38 = vsel %vm1159_vm11, %v1133_v27, %v1158_v25  ;;  %v2191_v31 = vsel %vm1153_vm8, %v2152_v10, %v2190_v6  ;;  %v1136_v0 = vadd.f32 %v1135_v41, %v1134_v33  ;;  %v3209_v39 = vrot.slane %v3208_v46, 4 }
 0x94b   :  { %v3205_v19 = vadd.f32 %v3204_v43, %v3203_v52  ;;  %v2157_v22 = vadd.f32 %v2156_v50, %v2155_v59  ;;  %v2162_v37 = vadd.f32 %v2161_v13, %v2160_v17  ;;  %v2124_v9 = vmul.f32 %v2115_v28, %v6227_v40 }
 0x94c   :  { %v1137_v51 = vrot.slane %v1136_v0, 2  ;;  %v3210_v36 = vadd.f32 %v3209_v39, %v3208_v46  ;;  %v2168_v21 = vrot.slane %v2167_v54, 4 }
 0x94d   :  { %v3206_v24 = vrot.slane %v3205_v19, 1  ;;  %v2158_v20 = vrot.slane %v2157_v22, 1  ;;  %v2163_v1 = vrot.slane %v2162_v37, 2  ;;  %v4148_v57 = vpop.permute.xlu1 %4147  ;;  %v2174_v3 = vsel %vm156_vm3, %v2124_v9, 0.0 }
 0x94e   :  { %v1138_v16 = vadd.f32 %v1137_v51, %v1136_v0  ;;  %v3211_v12 = vrot.slane %v3210_v36, 2  ;;  %v2175_v15 = vrot.slane %v2174_v3, 4  ;;  %v2169_v25 = vadd.f32 %v2168_v21, %v2167_v54 }
 0x94f   :  { %v3207_v56 = vadd.f32 %v3206_v24, %v3205_v19  ;;  %v2159_v55 = vadd.f32 %v2158_v20, %v2157_v22  ;;  %v2164_v47 = vadd.f32 %v2163_v1, %v2162_v37  ;;  %v4185_v8 = vmul.f32 %v4148_v57, %v6056_v58 }
 0x950   :  { %v1139_v14 = vrot.slane %v1138_v16, 1  ;;  %v3212_v34 = vadd.f32 %v3211_v12, %v3210_v36  ;;  %v2176_v7 = vadd.f32 %v2175_v15, %v2174_v3  ;;  %v2170_v48 = vrot.slane %v2169_v25, 2 }
 0x951   :  { %v3228_v32 = vsel %vm1159_vm11, %v3207_v56, %v3227_v45  ;;  %v2192_v53 = vsel %vm1155_vm9, %v2159_v55, %v2191_v31  ;;  %v2165_v26 = vrot.slane %v2164_v47, 1  ;;  %v4153_v63 = vpop.permute.xlu1 %4152  ;;  %v4193_v44 = vsel %vm156_vm3, %v4185_v8, 0.0 }
 0x952   :  { %v1140_v29 = vadd.f32 %v1139_v14, %v1138_v16  ;;  %v3213_v6 = vrot.slane %v3212_v34, 1  ;;  %v2177_v5 = vrot.slane %v2176_v7, 2  ;;  %v4194_v52 = vrot.slane %v4193_v44, 4 }
 0x953   :  { %v2166_v2 = vadd.f32 %v2165_v26, %v2164_v47  ;;  %v4186_v59 = vmul.f32 %v4153_v63, %v6059_v18  ;;  %v2171_v35 = vadd.f32 %v2170_v48, %v2169_v25 }
 0x954   :  { %v1162_v33 = vsel %vm1161_vm12, %v1140_v29, %v1160_v38  ;;  %v3214_v58 = vadd.f32 %v3213_v6, %v3212_v34  ;;  %v2178_v23 = vadd.f32 %v2177_v5, %v2176_v7  ;;  %v4195_v27 = vadd.f32 %v4194_v52, %v4193_v44 }
 0x955   :  { %1164 = vst.msk [vmem:[#allocation3] sm:$0xff] %vm156_vm3, %v1162_v33  ;;  %v2193_v45 = vsel %vm1157_vm10, %v2166_v2, %v2192_v53  ;;  %v4200_v10 = vsel %vm156_vm3, %v4186_v59, 0.0  ;;  %v4158_v41 = vpop.permute.xlu1 %4157  ;;  %v2172_v43 = vrot.slane %v2171_v35, 1 }
 0x956   :  { %v3229_v17 = vsel %vm1161_vm12, %v3214_v58, %v3228_v32  ;;  %v4201_v50 = vrot.slane %v4200_v10, 4  ;;  %v4187_v13 = vmul.f32 %v4158_v41, %v6061_v4  ;;  %v2179_v18 = vrot.slane %v2178_v23, 1 }
 0x957   :  { %3232 = vst.msk [vmem:[#allocation3 + $0x10] sm:$0xff] %vm156_vm3, %v3229_v17  ;;  %v4196_v46 = vrot.slane %v4195_v27, 2  ;;  %v2173_v28 = vadd.f32 %v2172_v43, %v2171_v35 }
 0x958   :  { %v4202_v38 = vadd.f32 %v4201_v50, %v4200_v10  ;;  %v4207_v31 = vsel %vm156_vm3, %v4187_v13, 0.0  ;;  %v2180_v0 = vadd.f32 %v2179_v18, %v2178_v23 }
 0x959   :  { %v4197_v39 = vadd.f32 %v4196_v46, %v4195_v27  ;;  %v4208_v19 = vrot.slane %v4207_v31, 4  ;;  %v4163_v22 = vpop.permute.xlu1 %4162  ;;  %v2194_v37 = vsel %vm1159_vm11, %v2173_v28, %v2193_v45 }
 0x95a   :  { %v4203_v49 = vrot.slane %v4202_v38, 2  ;;  %v4188_v30 = vmul.f32 %v4163_v22, %v6065_v42  ;;  %v2195_v51 = vsel %vm1161_vm12, %v2180_v0, %v2194_v37 }
 0x95b   :  { %v4209_v4 = vadd.f32 %v4208_v19, %v4207_v31  ;;  %2198 = vst.msk [vmem:[#allocation3 + $0x8] sm:$0xff] %vm156_vm3, %v2195_v51  ;;  %v4198_v36 = vrot.slane %v4197_v39, 1 }
 0x95c   :  { %v4204_v40 = vadd.f32 %v4203_v49, %v4202_v38  ;;  %v4214_v9 = vsel %vm156_vm3, %v4188_v30, 0.0 }
 0x95d   :  { %v4210_v24 = vrot.slane %v4209_v4, 2  ;;  %v4215_v20 = vrot.slane %v4214_v9, 4  ;;  %v4199_v16 = vadd.f32 %v4198_v36, %v4197_v39 }
 0x95e   :  { %v4205_v1 = vrot.slane %v4204_v40, 1 }
 0x95f   :  { %v4211_v54 = vadd.f32 %v4210_v24, %v4209_v4  ;;  %v4216_v57 = vadd.f32 %v4215_v20, %v4214_v9 }
 0x960   :  { %v4206_v12 = vadd.f32 %v4205_v1, %v4204_v40 }
 0x961   :  { %v4212_v21 = vrot.slane %v4211_v54, 1  ;;  %v4217_v3 = vrot.slane %v4216_v57, 2 }
 0x962   :  { %v4257_v42 = vsel %vm1149_vm6, %v4206_v12, %v4199_v16 }
 0x963   :  { %v4213_v56 = vadd.f32 %v4212_v21, %v4211_v54  ;;  %v4218_v55 = vadd.f32 %v4217_v3, %v4216_v57 }
 0x965   :  { %v4258_v47 = vsel %vm1151_vm7, %v4213_v56, %v4257_v42  ;;  %v4219_v15 = vrot.slane %v4218_v55, 1 }
 0x967   :  { %v4220_v14 = vadd.f32 %v4219_v15, %v4218_v55 }
 0x969   :  { %v4259_v34 = vsel %vm1153_vm8, %v4220_v14, %v4258_v47 }
 0x975   :  { %v4168_v25 = vpop.permute.xlu1 %4167 }
 0x976   :  { %v4189_v8 = vmul.f32 %v4168_v25, %v6092_v61 }
 0x978   :  { %v4221_v32 = vsel %vm156_vm3, %v4189_v8, 0.0 }
 0x979   :  { %v4222_v53 = vrot.slane %v4221_v32, 4 }
 0x97b   :  { %v4223_v26 = vadd.f32 %v4222_v53, %v4221_v32 }
 0x97d   :  { %v4224_v7 = vrot.slane %v4223_v26, 2  ;;  %v4173_v63 = vpop.permute.xlu1 %4172 }
 0x97e   :  { %v4190_v29 = vmul.f32 %v4173_v63, %v6109_v60 }
 0x97f   :  { %v4225_v6 = vadd.f32 %v4224_v7, %v4223_v26 }
 0x980   :  { %v4228_v48 = vsel %vm156_vm3, %v4190_v29, 0.0 }
 0x981   :  { %v4226_v44 = vrot.slane %v4225_v6, 1  ;;  %v4229_v2 = vrot.slane %v4228_v48, 4  ;;  %v4178_v5 = vpop.permute.xlu1 %4177 }
 0x982   :  { %v4191_v52 = vmul.f32 %v4178_v5, %v6111_v11 }
 0x983   :  { %v4227_v59 = vadd.f32 %v4226_v44, %v4225_v6  ;;  %v4230_v33 = vadd.f32 %v4229_v2, %v4228_v48 }
 0x984   :  { %v4235_v61 = vsel %vm156_vm3, %v4191_v52, 0.0 }
 0x985   :  { %v4260_v58 = vsel %vm1155_vm9, %v4227_v59, %v4259_v34  ;;  %v4231_v35 = vrot.slane %v4230_v33, 2  ;;  %v4236_v45 = vrot.slane %v4235_v61, 4  ;;  %v4183_v23 = vpop.permute.xlu1 %4182 }
 0x986   :  { %v4192_v27 = vmul.f32 %v4183_v23, %v6124_v62 }
 0x987   :  { %v4232_v60 = vadd.f32 %v4231_v35, %v4230_v33  ;;  %v4237_v10 = vadd.f32 %v4236_v45, %v4235_v61 }
 0x988   :  { %v4242_v41 = vsel %vm156_vm3, %v4192_v27, 0.0 }
 0x989   :  { %v4233_v17 = vrot.slane %v4232_v60, 1  ;;  %v4238_v43 = vrot.slane %v4237_v10, 2  ;;  %v4243_v50 = vrot.slane %v4242_v41, 4 }
 0x98b   :  { %v4234_v13 = vadd.f32 %v4233_v17, %v4232_v60  ;;  %v4239_v11 = vadd.f32 %v4238_v43, %v4237_v10  ;;  %v4244_v18 = vadd.f32 %v4243_v50, %v4242_v41 }
 0x98d   :  { %v4261_v46 = vsel %vm1157_vm10, %v4234_v13, %v4260_v58  ;;  %v4240_v28 = vrot.slane %v4239_v11, 1  ;;  %v4245_v38 = vrot.slane %v4244_v18, 2 }
 0x98f   :  { %v4241_v31 = vadd.f32 %v4240_v28, %v4239_v11  ;;  %v4246_v0 = vadd.f32 %v4245_v38, %v4244_v18 }
 0x991   :  { %v4262_v39 = vsel %vm1159_vm11, %v4241_v31, %v4261_v46  ;;  %v4247_v19 = vrot.slane %v4246_v0, 1 }
 0x993   :  { %v4248_v62 = vadd.f32 %v4247_v19, %v4246_v0 }
 0x995   :  { %v4263_v22 = vsel %vm1161_vm12, %v4248_v62, %v4262_v39 }
 0x996   :  { %4266 = vst.msk [vmem:[#allocation3 + $0x18] sm:$0xff] %vm156_vm3, %v4263_v22 }
 0x997   :  { %5043 = shalt.err (!%p5040_p4)
}
 0x998   :  { %s5044_s20 = scalar_lea.hbm %s6200_s3, 512 }
 0x999   :  { %p5045_p5 = scmp.ne.s32.totalorder %s6200_s3, %s5044_s20  ;;  %p5048_p6 = scmp.lt.u32.totalorder %s5044_s20, %s6200_s3 }
 0x99b   :  { %p5050_p7 = pnand %p5048_p6, %p5045_p5 }
 0x99d   :  { %5053 = shalt.err (!%p5050_p7)
}
 0x99e   :  { %s5071_s24 = smov 128   ;;  %s5072_s25 = smov 8  }
 0x99f   :  { %4278 = dma.vmem_to_hbm [thread:$0]  %s4273_s16, 512, %s6200_s3, [#allocation4], %s5071_s24, %s5071_s24, %s5072_s25  }
 0x9a0   :  { %5054 = dma.done.wait [#allocation4], 512  }
 0x9a1   :  { %5055 = vsyncadd [#allocation4], 4294966784 }
 0x9a2   :  { %4282 = vsyncpa [#allocation4], 1 }

</bundles_post_ra>
